<compile_context>
chip_gen: v7x
topology: tpu7x:2x2x1
jax: 0.10.0
libtpu: 0.0.40
codegen_flags: <defaults>
</compile_context>

<pallas_src>
import functools

import jax
import jax.numpy as jnp
import numpy as np
from jax.experimental import pallas as pl
from jax.experimental.pallas import tpu as pltpu

C_PAD = 128          # lane-dense class padding
_NEG_BIG = -1.0e30   # finite "-inf" sentinel (avoids inf-inf NaNs in the online softmax)
HIGH = jax.lax.Precision.HIGHEST  # only used by the pure-JAX reference


# ----------------------------------------------------------------------------
# Kernel 1: MLP (3 no-bias linears, ReLU between), tiled over neighbor rows.
#   inputs are bf16, accumulation in f32, logits stored f32 (n, C_PAD).
# ----------------------------------------------------------------------------
def _mlp_kernel(x_ref, w1_ref, w2_ref, w3_ref, logits_ref):
    h = jnp.dot(x_ref[...], w1_ref[...], preferred_element_type=jnp.float32)
    h = jnp.maximum(h, 0.0).astype(jnp.bfloat16)
    h = jnp.dot(h, w2_ref[...], preferred_element_type=jnp.float32)
    h = jnp.maximum(h, 0.0).astype(jnp.bfloat16)
    logits_ref[...] = jnp.dot(h, w3_ref[...], preferred_element_type=jnp.float32)


def mlp_logits_padded(Xb, W1b, W2b, W3pb, *, row_tile=128):
    n, f = Xb.shape
    h1 = W1b.shape[1]
    h2 = W2b.shape[1]
    tn = min(row_tile, n)
    assert n % tn == 0
    return pl.pallas_call(
        _mlp_kernel,
        out_shape=jax.ShapeDtypeStruct((n, C_PAD), jnp.float32),
        grid=(n // tn,),
        in_specs=[pl.BlockSpec((tn, f), lambda i: (i, 0)),
                  pl.BlockSpec((f, h1), lambda i: (0, 0)),
                  pl.BlockSpec((h1, h2), lambda i: (0, 0)),
                  pl.BlockSpec((h2, C_PAD), lambda i: (0, 0))],
        out_specs=pl.BlockSpec((tn, C_PAD), lambda i: (i, 0)),
        compiler_params=pltpu.CompilerParams(
            dimension_semantics=("parallel",)),
    )(Xb, W1b, W2b, W3pb)


# ----------------------------------------------------------------------------
# Kernel 2: fused soft weighted medoid over the k-neighborhood.
#   Grid iterates j-blocks of the neighbor axis (online softmax, "arbitrary").
#   Step 0 caches: bf16 logits (n, C_PAD) and transposed squared norms (1, n).
#   Per step jb:
#     D_blk[jj, l] = || logits[jb*TJ + jj] - logits[l] ||         (built in VMEM)
#     wd[i, jj]    = sum_l A[i, l] * D_blk[jj, l]                 (A @ D_blk^T)
#     valid        = (A[:, jb-block] >= kth_value) & (A > 0)      (top-k mask, in-kernel)
#     online-accumulate e = exp(-wd/T - running_max), pA = e * A:
#        l_acc += sum(pA),  acc += pA @ logits_blk
#   Finalize:  out = row_sum(A) * acc / l_acc
#   (the softmax normalizer cancels against the with_weight_correction normalizer)
# ----------------------------------------------------------------------------
def _agg_kernel(a_full_ref, a_col_ref, thr_ref, lg_full_ref, lg_blk_ref,
                out_ref, m_sc, l_sc, acc_sc, lgbf_sc, sqnT_sc,
                *, inv_temperature):
    jb = pl.program_id(0)

    @pl.when(jb == 0)
    def _init():
        m_sc[...] = jnp.full_like(m_sc, _NEG_BIG)
        l_sc[...] = jnp.zeros_like(l_sc)
        acc_sc[...] = jnp.zeros_like(acc_sc)
        lg = lg_full_ref[...]                                   # (n, C_PAD) f32
        lgbf_sc[...] = lg.astype(jnp.bfloat16)                  # cached bf16 logits
        sqn = jnp.sum(lg * lg, axis=-1, keepdims=True)          # (n, 1)
        sqnT_sc[...] = jnp.transpose(sqn)                       # cached (1, n)

    A_col = a_col_ref[...]         # (m, TJ)     f32, current column block of A
    thr = thr_ref[...]             # (m, 1)      f32, k-th largest PPR score per row
    lg_j = lg_blk_ref[...]         # (TJ, C_PAD) f32, current logits row block
    lg_j_bf = lg_j.astype(jnp.bfloat16)
    lg_bf = lgbf_sc[...]           # (n, C_PAD)  bf16, cached

    # pairwise distances of the current logit row-block against all logits
    sqn_j = jnp.sum(lg_j * lg_j, axis=-1, keepdims=True)        # (TJ, 1) f32
    gram = jax.lax.dot_general(lg_j_bf, lg_bf, (((1,), (1,)), ((), ())),
                               preferred_element_type=jnp.float32)   # (TJ, n)
    d2 = jnp.maximum(sqn_j + sqnT_sc[...] - 2.0 * gram, 0.0)
    dist = jnp.sqrt(d2)                                          # (TJ, n) f32

    # wd[i, jj] = sum_l A[i, l] * dist[jj, l]
    wd = jax.lax.dot_general(a_full_ref[...].astype(jnp.bfloat16),
                             dist.astype(jnp.bfloat16),
                             (((1,), (1,)), ((), ())),
                             preferred_element_type=jnp.float32)      # (m, TJ)

    # top-k mask built in-kernel from the per-row threshold
    # (exact top-k for distinct scores; ties at the k-th value may select extra cols)
    valid = (A_col >= thr) & (A_col > 0.0)

    neg = jnp.where(valid, -wd * inv_temperature, _NEG_BIG)
    m_new = jnp.maximum(m_sc[...], jnp.max(neg, axis=-1, keepdims=True))
    alpha = jnp.exp(m_sc[...] - m_new)
    p = jnp.where(valid, jnp.exp(neg - m_new), 0.0)
    pA = p * A_col                                   # unnormalised corrected weights
    l_sc[...] = alpha * l_sc[...] + jnp.sum(pA, axis=-1, keepdims=True)
    acc_sc[...] = alpha * acc_sc[...] + jnp.dot(
        pA.astype(jnp.bfloat16), lg_j_bf, preferred_element_type=jnp.float32)
    m_sc[...] = m_new

    @pl.when(jb == pl.num_programs(0) - 1)
    def _finalize():
        row_sum = jnp.sum(a_full_ref[...], axis=-1, keepdims=True)
        denom = l_sc[...]
        safe = jnp.where(denom > 0.0, denom, 1.0)
        out = row_sum * acc_sc[...] * pl.reciprocal(safe, approx=True)
        # guard all-zero rows (reference/PyTorch would give NaN there)
        out_ref[...] = jnp.where(denom > 0.0, out, 0.0).astype(out_ref.dtype)


def soft_k_medoid_agg(A, thresh, logits_pad, *, temperature, j_tile=128):
    m, n = A.shape
    c_pad = logits_pad.shape[1]
    tj = min(j_tile, n)
    assert n % tj == 0 and tj % 8 == 0
    kern = functools.partial(_agg_kernel, inv_temperature=float(1.0 / temperature))
    return pl.pallas_call(
        kern,
        out_shape=jax.ShapeDtypeStruct((m, c_pad), jnp.float32),
        grid=(n // tj,),
        in_specs=[pl.BlockSpec((m, n), lambda j: (0, 0)),        # A, resident
                  pl.BlockSpec((m, tj), lambda j: (0, j)),       # A column block
                  pl.BlockSpec((m, 1), lambda j: (0, 0)),        # per-row k-th value
                  pl.BlockSpec((n, c_pad), lambda j: (0, 0)),    # logits, resident
                  pl.BlockSpec((tj, c_pad), lambda j: (j, 0))],  # logits row block
        out_specs=pl.BlockSpec((m, c_pad), lambda j: (0, 0)),
        scratch_shapes=[pltpu.VMEM((m, 1), jnp.float32),         # running max
                        pltpu.VMEM((m, 1), jnp.float32),         # running sum(e*A)
                        pltpu.VMEM((m, c_pad), jnp.float32),     # running e*A @ logits
                        pltpu.VMEM((n, c_pad), jnp.bfloat16),    # cached bf16 logits
                        pltpu.VMEM((1, n), jnp.float32)],        # cached |logit|^2 row
        compiler_params=pltpu.CompilerParams(
            dimension_semantics=("arbitrary",),
            vmem_limit_bytes=64 * 1024 * 1024),
    )(A, A, thresh, logits_pad, logits_pad)


@functools.partial(jax.jit, static_argnames=("k", "temperature", "row_tile", "j_tile"))
def robust_pprgo_forward(X, A, weights, *, k, temperature, row_tile=128, j_tile=128):
    """X: (n_neighbors, n_features); A: densified ppr_scores (batch, n_neighbors)."""
    W1, W2, W3 = weights
    n = X.shape[0]
    c = W3.shape[1]
    assert k <= n  # TODO(synk): k > n fallback (soft_weighted_medoid, no weight correction) not implemented
    assert c <= C_PAD

    # zero-pad class dim to 128 lanes; cast matmul operands to bf16 (f32 accumulation)
    W3p = jnp.pad(W3, ((0, 0), (0, C_PAD - c)))
    logits = mlp_logits_padded(X.astype(jnp.bfloat16), W1.astype(jnp.bfloat16),
                               W2.astype(jnp.bfloat16), W3p.astype(jnp.bfloat16),
                               row_tile=row_tile)

    # per-row k-th largest PPR score; the top-k mask itself is built in-kernel.
    # TODO(synk): exact duplicates at the k-th value select >k neighbors (top_k tie-break differs)
    thresh = jax.lax.top_k(A, k)[0][:, k - 1:k]              # (m, 1)

    out_p = soft_k_medoid_agg(A, thresh, logits, temperature=temperature, j_tile=j_tile)
    return out_p[:, :c]


# ----------------------------------------------------------------------------
# Pure-JAX reference mirroring the PyTorch dense soft_k_medoid path (f32, HIGHEST)
# ----------------------------------------------------------------------------
def ref_forward(X, A, weights, *, k, temperature):
    W1, W2, W3 = weights
    h = jnp.maximum(jnp.dot(X, W1, precision=HIGH), 0.0)
    h = jnp.maximum(jnp.dot(h, W2, precision=HIGH), 0.0)
    logits = jnp.dot(h, W3, precision=HIGH)

    sqn = jnp.sum(logits * logits, axis=-1, keepdims=True)
    D = jnp.sqrt(jnp.maximum(
        sqn + sqn.T - 2.0 * jnp.dot(logits, logits.T, precision=HIGH), 0.0))

    m, _ = A.shape
    top_val, top_idx = jax.lax.top_k(A, k)
    dist_tk = jnp.einsum('il,icl->ic', A, D[top_idx], precision=HIGH)
    dist_tk = jnp.where(top_val == 0, jnp.finfo(jnp.float32).max, dist_tk)
    s = jax.nn.softmax(-dist_tk / temperature, axis=-1)
    tw = jnp.zeros_like(A).at[jnp.arange(m)[:, None], top_idx].set(s)
    tw = tw.at[jnp.arange(m)[:, None], top_idx].multiply(top_val)  # weight correction
    tw = tw / jnp.sum(tw, axis=-1, keepdims=True)
    row_sum = jnp.sum(A, axis=-1, keepdims=True)
    return row_sum * jnp.dot(tw, logits, precision=HIGH)


if __name__ == "__main__":
    # small shapes: n_neighbors=256 (2 neighbor tiles -> exercises the online softmax),
    # n_features=64, n_filters=[64, 32], n_classes=8, batch=8
    n_neighbors, n_features, n_classes = 256, 64, 8
    n_filters = [64, 32]
    batch = 8
    k, temperature = 64, 1.0   # default mean_kwargs (with_weight_correction=True)

    key = jax.random.PRNGKey(0)
    k1, k2, k3, k4, k5 = jax.random.split(key, 5)
    X = jax.random.normal(k1, (n_neighbors, n_features), jnp.float32)
    W1 = jax.random.normal(k2, (n_features, n_filters[0]), jnp.float32) / np.sqrt(n_features)
    W2 = jax.random.normal(k3, (n_filters[0], n_filters[1]), jnp.float32) / np.sqrt(n_filters[0])
    W3 = jax.random.normal(k4, (n_filters[1], n_classes), jnp.float32) / np.sqrt(n_filters[1])
    # dense PPR scores: strictly positive rows that sum to 1
    A = jax.random.uniform(k5, (batch, n_neighbors), jnp.float32, minval=0.01, maxval=1.0)
    A = A / jnp.sum(A, axis=-1, keepdims=True)

    out = robust_pprgo_forward(X, A, (W1, W2, W3), k=k, temperature=temperature)
    out = jax.block_until_ready(out)
    assert out.shape == (batch, n_classes)

    ref = jax.block_until_ready(
        ref_forward(X, A, (W1, W2, W3), k=k, temperature=temperature))
    # looser tolerance than the f32/HIGHEST reference because kernel matmuls use
    # bf16 operands (f32 accumulation).
    np.testing.assert_allclose(np.asarray(out), np.asarray(ref), rtol=5e-2, atol=5e-2)

    print("KERNEL_OK")
</pallas_src>

<mosaic_0001>
module attributes {stable_mosaic.version = 11 : i64} {
  func.func @_mlp_kernel(%arg0: i32, %arg1: memref<128x64xbf16, #tpu.memory_space<vmem>>, %arg2: memref<64x64xbf16, #tpu.memory_space<vmem>>, %arg3: memref<64x32xbf16, #tpu.memory_space<vmem>>, %arg4: memref<32x128xbf16, #tpu.memory_space<vmem>>, %arg5: memref<128x128xf32, #tpu.memory_space<vmem>>) attributes {dimension_semantics = [#tpu.dimension_semantics<parallel>], iteration_bounds = array<i64: 2>, scalar_prefetch = 0 : i64, scratch_operands = 0 : i64, tpu.core_type = #tpu.core_type<tc>, window_params = [{transform_indices = @transform_0, window_bounds = array<i64: 128, 64>}, {pipeline_mode = #tpu.pipeline_mode<synchronous>, transform_indices = @transform_1, window_bounds = array<i64: 64, 64>}, {pipeline_mode = #tpu.pipeline_mode<synchronous>, transform_indices = @transform_2, window_bounds = array<i64: 64, 32>}, {pipeline_mode = #tpu.pipeline_mode<synchronous>, transform_indices = @transform_3, window_bounds = array<i64: 32, 128>}, {transform_indices = @transform_4, window_bounds = array<i64: 128, 128>}]} {
    %c0 = arith.constant 0 : index
    %c0_0 = arith.constant 0 : index
    %0 = vector.load %arg1[%c0, %c0_0] : memref<128x64xbf16, #tpu.memory_space<vmem>>, vector<128x64xbf16>
    %c0_1 = arith.constant 0 : index
    %c0_2 = arith.constant 0 : index
    %1 = vector.load %arg2[%c0_1, %c0_2] : memref<64x64xbf16, #tpu.memory_space<vmem>>, vector<64x64xbf16>
    %cst = arith.constant dense<0.000000e+00> : vector<128x64xf32>
    %2 = tpu.matmul %0, %1, %cst {dimension_numbers = #tpu.dot_dimension_numbers<[1], [0], [0], [1], [0, 0, 1, 1], [], []>} : vector<128x64xbf16>, vector<64x64xbf16>, vector<128x64xf32> -> vector<128x64xf32>
    %cst_3 = arith.constant 0.000000e+00 : f32
    %3 = vector.broadcast %cst_3 : f32 to vector<128x64xf32>
    %4 = arith.maximumf %2, %3 : vector<128x64xf32>
    %5 = arith.truncf %4 : vector<128x64xf32> to vector<128x64xbf16>
    %c0_4 = arith.constant 0 : index
    %c0_5 = arith.constant 0 : index
    %6 = vector.load %arg3[%c0_4, %c0_5] : memref<64x32xbf16, #tpu.memory_space<vmem>>, vector<64x32xbf16>
    %cst_6 = arith.constant dense<0.000000e+00> : vector<128x32xf32>
    %7 = tpu.matmul %5, %6, %cst_6 {dimension_numbers = #tpu.dot_dimension_numbers<[1], [0], [0], [1], [0, 0, 1, 1], [], []>} : vector<128x64xbf16>, vector<64x32xbf16>, vector<128x32xf32> -> vector<128x32xf32>
    %cst_7 = arith.constant 0.000000e+00 : f32
    %8 = vector.broadcast %cst_7 : f32 to vector<128x32xf32>
    %9 = arith.maximumf %7, %8 : vector<128x32xf32>
    %10 = arith.truncf %9 : vector<128x32xf32> to vector<128x32xbf16>
    %c0_8 = arith.constant 0 : index
    %c0_9 = arith.constant 0 : index
    %11 = vector.load %arg4[%c0_8, %c0_9] : memref<32x128xbf16, #tpu.memory_space<vmem>>, vector<32x128xbf16>
    %cst_10 = arith.constant dense<0.000000e+00> : vector<128x128xf32>
    %12 = tpu.matmul %10, %11, %cst_10 {dimension_numbers = #tpu.dot_dimension_numbers<[1], [0], [0], [1], [0, 0, 1, 1], [], []>} : vector<128x32xbf16>, vector<32x128xbf16>, vector<128x128xf32> -> vector<128x128xf32>
    %c0_11 = arith.constant 0 : index
    %c0_12 = arith.constant 0 : index
    %13 = vector.load %arg5[%c0_11, %c0_12] : memref<128x128xf32, #tpu.memory_space<vmem>>, vector<128x128xf32>
    tpu.vector_store %arg5[%c0_11, %c0_12], %12 {strides = array<i32>} : memref<128x128xf32, #tpu.memory_space<vmem>>, vector<128x128xf32>,
    return
  }
  func.func @transform_0(%arg0: i32) -> (i32, i32) {
    %c0_i32 = arith.constant 0 : i32
    %c0_i32_0 = arith.constant 0 : i32
    return %arg0, %c0_i32 : i32, i32
  }
  func.func @transform_1(%arg0: i32) -> (i32, i32) {
    %c0_i32 = arith.constant 0 : i32
    %c0_i32_0 = arith.constant 0 : i32
    %c0_i32_1 = arith.constant 0 : i32
    return %c0_i32, %c0_i32_0 : i32, i32
  }
  func.func @transform_2(%arg0: i32) -> (i32, i32) {
    %c0_i32 = arith.constant 0 : i32
    %c0_i32_0 = arith.constant 0 : i32
    %c0_i32_1 = arith.constant 0 : i32
    return %c0_i32, %c0_i32_0 : i32, i32
  }
  func.func @transform_3(%arg0: i32) -> (i32, i32) {
    %c0_i32 = arith.constant 0 : i32
    %c0_i32_0 = arith.constant 0 : i32
    %c0_i32_1 = arith.constant 0 : i32
    return %c0_i32, %c0_i32_0 : i32, i32
  }
  func.func @transform_4(%arg0: i32) -> (i32, i32) {
    %c0_i32 = arith.constant 0 : i32
    %c0_i32_0 = arith.constant 0 : i32
    return %arg0, %c0_i32 : i32, i32
  }
}

module attributes {stable_mosaic.version = 11 : i64} {
  func.func @_agg_kernel(%arg0: i32, %arg1: memref<8x256xf32, #tpu.memory_space<vmem>>, %arg2: memref<8x128xf32, #tpu.memory_space<vmem>>, %arg3: memref<8x1xf32, #tpu.memory_space<vmem>>, %arg4: memref<256x128xf32, #tpu.memory_space<vmem>>, %arg5: memref<128x128xf32, #tpu.memory_space<vmem>>, %arg6: memref<8x128xf32, #tpu.memory_space<vmem>>, %arg7: memref<8x1xf32, #tpu.memory_space<vmem>>, %arg8: memref<8x1xf32, #tpu.memory_space<vmem>>, %arg9: memref<8x128xf32, #tpu.memory_space<vmem>>, %arg10: memref<256x128xbf16, #tpu.memory_space<vmem>>, %arg11: memref<1x256xf32, #tpu.memory_space<vmem>>) attributes {dimension_semantics = [#tpu.dimension_semantics<arbitrary>], iteration_bounds = array<i64: 2>, scalar_prefetch = 0 : i64, scratch_operands = 5 : i64, tpu.core_type = #tpu.core_type<tc>, window_params = [{pipeline_mode = #tpu.pipeline_mode<synchronous>, transform_indices = @transform_0, window_bounds = array<i64: 8, 256>}, {transform_indices = @transform_1, window_bounds = array<i64: 8, 128>}, {pipeline_mode = #tpu.pipeline_mode<synchronous>, transform_indices = @transform_2, window_bounds = array<i64: 8, 1>}, {pipeline_mode = #tpu.pipeline_mode<synchronous>, transform_indices = @transform_3, window_bounds = array<i64: 256, 128>}, {transform_indices = @transform_4, window_bounds = array<i64: 128, 128>}, {pipeline_mode = #tpu.pipeline_mode<synchronous>, transform_indices = @transform_5, window_bounds = array<i64: 8, 128>}]} {
    %c0_i32 = arith.constant 0 : i32
    %0 = arith.cmpi eq, %arg0, %c0_i32 : i32
    %1 = arith.extui %0 : i1 to i32
    %c0_i32_0 = arith.constant 0 : i32
    %2 = arith.cmpi ne, %1, %c0_i32_0 : i32
    scf.if %2 {
      %cst_39 = arith.constant -1.000000e+30 : f32
      %67 = vector.broadcast %cst_39 : f32 to vector<8x1xf32>
      %c0_40 = arith.constant 0 : index
      %c0_41 = arith.constant 0 : index
      %68 = vector.load %arg7[%c0_40, %c0_41] : memref<8x1xf32, #tpu.memory_space<vmem>>, vector<8x1xf32>
      tpu.vector_store %arg7[%c0_40, %c0_41], %67 {strides = array<i32>} : memref<8x1xf32, #tpu.memory_space<vmem>>, vector<8x1xf32>,
      %cst_42 = arith.constant 0.000000e+00 : f32
      %69 = vector.broadcast %cst_42 : f32 to vector<8x1xf32>
      %c0_43 = arith.constant 0 : index
      %c0_44 = arith.constant 0 : index
      %70 = vector.load %arg8[%c0_43, %c0_44] : memref<8x1xf32, #tpu.memory_space<vmem>>, vector<8x1xf32>
      tpu.vector_store %arg8[%c0_43, %c0_44], %69 {strides = array<i32>} : memref<8x1xf32, #tpu.memory_space<vmem>>, vector<8x1xf32>,
      %cst_45 = arith.constant 0.000000e+00 : f32
      %71 = vector.broadcast %cst_45 : f32 to vector<8x128xf32>
      %c0_46 = arith.constant 0 : index
      %c0_47 = arith.constant 0 : index
      %72 = vector.load %arg9[%c0_46, %c0_47] : memref<8x128xf32, #tpu.memory_space<vmem>>, vector<8x128xf32>
      tpu.vector_store %arg9[%c0_46, %c0_47], %71 {strides = array<i32>} : memref<8x128xf32, #tpu.memory_space<vmem>>, vector<8x128xf32>,
      %c0_48 = arith.constant 0 : index
      %c0_49 = arith.constant 0 : index
      %73 = vector.load %arg4[%c0_48, %c0_49] : memref<256x128xf32, #tpu.memory_space<vmem>>, vector<256x128xf32>
      %74 = arith.truncf %73 : vector<256x128xf32> to vector<256x128xbf16>
      %c0_50 = arith.constant 0 : index
      %c0_51 = arith.constant 0 : index
      %75 = vector.load %arg10[%c0_50, %c0_51] : memref<256x128xbf16, #tpu.memory_space<vmem>>, vector<256x128xbf16>
      tpu.vector_store %arg10[%c0_50, %c0_51], %74 {strides = array<i32>} : memref<256x128xbf16, #tpu.memory_space<vmem>>, vector<256x128xbf16>,
      %76 = arith.mulf %73, %73 : vector<256x128xf32>
      %cst_52 = arith.constant dense<0.000000e+00> : vector<256xf32>
      %77 = vector.multi_reduction <add>, %76, %cst_52 [1] : vector<256x128xf32> to vector<256xf32>
      %78 = vector.shape_cast %77 : vector<256xf32> to vector<256x1xf32>
      %79 = tpu.transpose %78, [1, 0] : vector<256x1xf32> -> vector<1x256xf32>
      %c0_53 = arith.constant 0 : index
      %c0_54 = arith.constant 0 : index
      %80 = vector.load %arg11[%c0_53, %c0_54] : memref<1x256xf32, #tpu.memory_space<vmem>>, vector<1x256xf32>
      tpu.vector_store %arg11[%c0_53, %c0_54], %79 {strides = array<i32>} : memref<1x256xf32, #tpu.memory_space<vmem>>, vector<1x256xf32>,
    } else {
    }
    %c0 = arith.constant 0 : index
    %c0_1 = arith.constant 0 : index
    %3 = vector.load %arg2[%c0, %c0_1] : memref<8x128xf32, #tpu.memory_space<vmem>>, vector<8x128xf32>
    %c0_2 = arith.constant 0 : index
    %c0_3 = arith.constant 0 : index
    %4 = vector.load %arg3[%c0_2, %c0_3] : memref<8x1xf32, #tpu.memory_space<vmem>>, vector<8x1xf32>
    %c0_4 = arith.constant 0 : index
    %c0_5 = arith.constant 0 : index
    %5 = vector.load %arg5[%c0_4, %c0_5] : memref<128x128xf32, #tpu.memory_space<vmem>>, vector<128x128xf32>
    %6 = arith.truncf %5 : vector<128x128xf32> to vector<128x128xbf16>
    %c0_6 = arith.constant 0 : index
    %c0_7 = arith.constant 0 : index
    %7 = vector.load %arg10[%c0_6, %c0_7] : memref<256x128xbf16, #tpu.memory_space<vmem>>, vector<256x128xbf16>
    %8 = arith.mulf %5, %5 : vector<128x128xf32>
    %cst = arith.constant dense<0.000000e+00> : vector<128xf32>
    %9 = vector.multi_reduction <add>, %8, %cst [1] : vector<128x128xf32> to vector<128xf32>
    %10 = vector.shape_cast %9 : vector<128xf32> to vector<128x1xf32>
    %cst_8 = arith.constant dense<0.000000e+00> : vector<128x256xf32>
    %11 = tpu.matmul %6, %7, %cst_8 {dimension_numbers = #tpu.dot_dimension_numbers<[1], [1], [0], [0], [0, 0, 1, 0], [], []>} : vector<128x128xbf16>, vector<256x128xbf16>, vector<128x256xf32> -> vector<128x256xf32>
    %c0_9 = arith.constant 0 : index
    %c0_10 = arith.constant 0 : index
    %12 = vector.load %arg11[%c0_9, %c0_10] : memref<1x256xf32, #tpu.memory_space<vmem>>, vector<1x256xf32>
    %13 = vector.broadcast %10 : vector<128x1xf32> to vector<128x256xf32>
    %14 = vector.broadcast %12 : vector<1x256xf32> to vector<128x256xf32>
    %15 = arith.addf %13, %14 : vector<128x256xf32>
    %cst_11 = arith.constant 2.000000e+00 : f32
    %16 = vector.broadcast %cst_11 : f32 to vector<128x256xf32>
    %17 = arith.mulf %16, %11 : vector<128x256xf32>
    %18 = arith.subf %15, %17 : vector<128x256xf32>
    %cst_12 = arith.constant 0.000000e+00 : f32
    %19 = vector.broadcast %cst_12 : f32 to vector<128x256xf32>
    %20 = arith.maximumf %18, %19 : vector<128x256xf32>
    %21 = math.sqrt %20 : vector<128x256xf32>
    %c0_13 = arith.constant 0 : index
    %c0_14 = arith.constant 0 : index
    %22 = vector.load %arg1[%c0_13, %c0_14] : memref<8x256xf32, #tpu.memory_space<vmem>>, vector<8x256xf32>
    %23 = arith.truncf %22 : vector<8x256xf32> to vector<8x256xbf16>
    %24 = arith.truncf %21 : vector<128x256xf32> to vector<128x256xbf16>
    %cst_15 = arith.constant dense<0.000000e+00> : vector<8x128xf32>
    %25 = tpu.matmul %23, %24, %cst_15 {dimension_numbers = #tpu.dot_dimension_numbers<[1], [1], [0], [0], [0, 0, 1, 0], [], []>} : vector<8x256xbf16>, vector<128x256xbf16>, vector<8x128xf32> -> vector<8x128xf32>
    %26 = vector.broadcast %4 : vector<8x1xf32> to vector<8x128xf32>
    %27 = arith.cmpf oge, %3, %26 : vector<8x128xf32>
    %cst_16 = arith.constant 0.000000e+00 : f32
    %28 = vector.broadcast %cst_16 : f32 to vector<8x128xf32>
    %29 = arith.cmpf ogt, %3, %28 : vector<8x128xf32>
    %30 = arith.andi %27, %29 : vector<8x128xi1>
    %cst_17 = arith.constant 0.000000e+00 : f32
    %31 = vector.broadcast %cst_17 : f32 to vector<8x128xf32>
    %32 = arith.subf %31, %25 : vector<8x128xf32>
    %cst_18 = arith.constant 1.000000e+00 : f32
    %33 = vector.broadcast %cst_18 : f32 to vector<8x128xf32>
    %34 = arith.mulf %32, %33 : vector<8x128xf32>
    %cst_19 = arith.constant -1.000000e+30 : f32
    %35 = vector.broadcast %cst_19 : f32 to vector<8x128xf32>
    %36 = arith.select %30, %34, %35 : vector<8x128xi1>, vector<8x128xf32>
    %c0_20 = arith.constant 0 : index
    %c0_21 = arith.constant 0 : index
    %37 = vector.load %arg7[%c0_20, %c0_21] : memref<8x1xf32, #tpu.memory_space<vmem>>, vector<8x1xf32>
    %cst_22 = arith.constant dense<0xFF800000> : vector<8xf32>
    %38 = vector.multi_reduction <maximumf>, %36, %cst_22 [1] : vector<8x128xf32> to vector<8xf32>
    %39 = vector.shape_cast %38 : vector<8xf32> to vector<8x1xf32>
    %40 = arith.maximumf %37, %39 : vector<8x1xf32>
    %c0_23 = arith.constant 0 : index
    %c0_24 = arith.constant 0 : index
    %41 = vector.load %arg7[%c0_23, %c0_24] : memref<8x1xf32, #tpu.memory_space<vmem>>, vector<8x1xf32>
    %42 = arith.subf %41, %40 : vector<8x1xf32>
    %43 = math.exp %42 : vector<8x1xf32>
    %44 = vector.broadcast %40 : vector<8x1xf32> to vector<8x128xf32>
    %45 = arith.subf %36, %44 : vector<8x128xf32>
    %46 = math.exp %45 : vector<8x128xf32>
    %cst_25 = arith.constant 0.000000e+00 : f32
    %47 = vector.broadcast %cst_25 : f32 to vector<8x128xf32>
    %48 = arith.select %30, %46, %47 : vector<8x128xi1>, vector<8x128xf32>
    %49 = arith.mulf %48, %3 : vector<8x128xf32>
    %c0_26 = arith.constant 0 : index
    %c0_27 = arith.constant 0 : index
    %50 = vector.load %arg8[%c0_26, %c0_27] : memref<8x1xf32, #tpu.memory_space<vmem>>, vector<8x1xf32>
    %51 = arith.mulf %43, %50 : vector<8x1xf32>
    %cst_28 = arith.constant dense<0.000000e+00> : vector<8xf32>
    %52 = vector.multi_reduction <add>, %49, %cst_28 [1] : vector<8x128xf32> to vector<8xf32>
    %53 = vector.shape_cast %52 : vector<8xf32> to vector<8x1xf32>
    %54 = arith.addf %51, %53 : vector<8x1xf32>
    %c0_29 = arith.constant 0 : index
    %c0_30 = arith.constant 0 : index
    %55 = vector.load %arg8[%c0_29, %c0_30] : memref<8x1xf32, #tpu.memory_space<vmem>>, vector<8x1xf32>
    tpu.vector_store %arg8[%c0_29, %c0_30], %54 {strides = array<i32>} : memref<8x1xf32, #tpu.memory_space<vmem>>, vector<8x1xf32>,
    %c0_31 = arith.constant 0 : index
    %c0_32 = arith.constant 0 : index
    %56 = vector.load %arg9[%c0_31, %c0_32] : memref<8x128xf32, #tpu.memory_space<vmem>>, vector<8x128xf32>
    %57 = vector.broadcast %43 : vector<8x1xf32> to vector<8x128xf32>
    %58 = arith.mulf %57, %56 : vector<8x128xf32>
    %59 = arith.truncf %49 : vector<8x128xf32> to vector<8x128xbf16>
    %cst_33 = arith.constant dense<0.000000e+00> : vector<8x128xf32>
    %60 = tpu.matmul %59, %6, %cst_33 {dimension_numbers = #tpu.dot_dimension_numbers<[1], [0], [0], [1], [0, 0, 1, 1], [], []>} : vector<8x128xbf16>, vector<128x128xbf16>, vector<8x128xf32> -> vector<8x128xf32>
    %61 = arith.addf %58, %60 : vector<8x128xf32>
    %c0_34 = arith.constant 0 : index
    %c0_35 = arith.constant 0 : index
    %62 = vector.load %arg9[%c0_34, %c0_35] : memref<8x128xf32, #tpu.memory_space<vmem>>, vector<8x128xf32>
    tpu.vector_store %arg9[%c0_34, %c0_35], %61 {strides = array<i32>} : memref<8x128xf32, #tpu.memory_space<vmem>>, vector<8x128xf32>,
    %c0_36 = arith.constant 0 : index
    %c0_37 = arith.constant 0 : index
    %63 = vector.load %arg7[%c0_36, %c0_37] : memref<8x1xf32, #tpu.memory_space<vmem>>, vector<8x1xf32>
    tpu.vector_store %arg7[%c0_36, %c0_37], %40 {strides = array<i32>} : memref<8x1xf32, #tpu.memory_space<vmem>>, vector<8x1xf32>,
    %c1_i32 = arith.constant 1 : i32
    %64 = arith.cmpi eq, %arg0, %c1_i32 : i32
    %65 = arith.extui %64 : i1 to i32
    %c0_i32_38 = arith.constant 0 : i32
    %66 = arith.cmpi ne, %65, %c0_i32_38 : i32
    scf.if %66 {
      %c0_39 = arith.constant 0 : index
      %c0_40 = arith.constant 0 : index
      %67 = vector.load %arg1[%c0_39, %c0_40] : memref<8x256xf32, #tpu.memory_space<vmem>>, vector<8x256xf32>
      %cst_41 = arith.constant dense<0.000000e+00> : vector<8xf32>
      %68 = vector.multi_reduction <add>, %67, %cst_41 [1] : vector<8x256xf32> to vector<8xf32>
      %69 = vector.shape_cast %68 : vector<8xf32> to vector<8x1xf32>
      %c0_42 = arith.constant 0 : index
      %c0_43 = arith.constant 0 : index
      %70 = vector.load %arg8[%c0_42, %c0_43] : memref<8x1xf32, #tpu.memory_space<vmem>>, vector<8x1xf32>
      %cst_44 = arith.constant 0.000000e+00 : f32
      %71 = vector.broadcast %cst_44 : f32 to vector<8x1xf32>
      %72 = arith.cmpf ogt, %70, %71 : vector<8x1xf32>
      %cst_45 = arith.constant 1.000000e+00 : f32
      %73 = vector.broadcast %cst_45 : f32 to vector<8x1xf32>
      %74 = arith.select %72, %70, %73 : vector<8x1xi1>, vector<8x1xf32>
      %c0_46 = arith.constant 0 : index
      %c0_47 = arith.constant 0 : index
      %75 = vector.load %arg9[%c0_46, %c0_47] : memref<8x128xf32, #tpu.memory_space<vmem>>, vector<8x128xf32>
      %76 = vector.broadcast %69 : vector<8x1xf32> to vector<8x128xf32>
      %77 = arith.mulf %76, %75 : vector<8x128xf32>
      %78 = tpu.reciprocal %74 {approx = true} : vector<8x1xf32> -> vector<8x1xf32>
      %79 = vector.broadcast %78 : vector<8x1xf32> to vector<8x128xf32>
      %80 = arith.mulf %77, %79 : vector<8x128xf32>
      %cst_48 = arith.constant 0.000000e+00 : f32
      %81 = vector.broadcast %cst_48 : f32 to vector<8x1xf32>
      %82 = arith.cmpf ogt, %70, %81 : vector<8x1xf32>
      %cst_49 = arith.constant 0.000000e+00 : f32
      %83 = vector.shape_cast %82 : vector<8x1xi1> to vector<8x1xi1>
      %84 = vector.broadcast %83 : vector<8x1xi1> to vector<8x128xi1>
      %85 = vector.broadcast %cst_49 : f32 to vector<8x128xf32>
      %86 = arith.select %84, %80, %85 : vector<8x128xi1>, vector<8x128xf32>
      %c0_50 = arith.constant 0 : index
      %c0_51 = arith.constant 0 : index
      %87 = vector.load %arg6[%c0_50, %c0_51] : memref<8x128xf32, #tpu.memory_space<vmem>>, vector<8x128xf32>
      tpu.vector_store %arg6[%c0_50, %c0_51], %86 {strides = array<i32>} : memref<8x128xf32, #tpu.memory_space<vmem>>, vector<8x128xf32>,
    } else {
    }
    return
  }
  func.func @transform_0(%arg0: i32) -> (i32, i32) {
    %c0_i32 = arith.constant 0 : i32
    %c0_i32_0 = arith.constant 0 : i32
    %c0_i32_1 = arith.constant 0 : i32
    return %c0_i32, %c0_i32_0 : i32, i32
  }
  func.func @transform_1(%arg0: i32) -> (i32, i32) {
    %c0_i32 = arith.constant 0 : i32
    %c0_i32_0 = arith.constant 0 : i32
    return %c0_i32, %arg0 : i32, i32
  }
  func.func @transform_2(%arg0: i32) -> (i32, i32) {
    %c0_i32 = arith.constant 0 : i32
    %c0_i32_0 = arith.constant 0 : i32
    %c0_i32_1 = arith.constant 0 : i32
    return %c0_i32, %c0_i32_0 : i32, i32
  }
  func.func @transform_3(%arg0: i32) -> (i32, i32) {
    %c0_i32 = arith.constant 0 : i32
    %c0_i32_0 = arith.constant 0 : i32
    %c0_i32_1 = arith.constant 0 : i32
    return %c0_i32, %c0_i32_0 : i32, i32
  }
  func.func @transform_4(%arg0: i32) -> (i32, i32) {
    %c0_i32 = arith.constant 0 : i32
    %c0_i32_0 = arith.constant 0 : i32
    return %arg0, %c0_i32 : i32, i32
  }
  func.func @transform_5(%arg0: i32) -> (i32, i32) {
    %c0_i32 = arith.constant 0 : i32
    %c0_i32_0 = arith.constant 0 : i32
    %c0_i32_1 = arith.constant 0 : i32
    return %c0_i32, %c0_i32_0 : i32, i32
  }
}

</mosaic_0001>

<bundles_post_ra>
// kernel: robust_pprgo_forward.2
= control target key start
LH: loop header
LB: loop body
LE: loop exit
PB: predicated region body
PF: predicated region fallthrough
CT: control target
= control target key end

     0   :  { %9 = vsyncpa [#allocation3], 0  ;;  %s1336_s0 = inlined_call_operand.vmem [shape: bf16[256,64], index: 0, kind: input, shape index: {}]   ;;  %s1337_s1 = inlined_call_operand.vmem [shape: bf16[64,64], index: 1, kind: input, shape index: {}]   ;;  %s1338_s2 = inlined_call_operand.vmem [shape: bf16[64,32], index: 2, kind: input, shape index: {}]   ;;  %s1339_s3 = inlined_call_operand.vmem [shape: bf16[32,128], index: 3, kind: input, shape index: {}]   ;;  %s1340_s4 = inlined_call_operand.hbm [shape: f32[256,128], index: 4, kind: output, shape index: {}]  }
   0x1   :  { %11 = vsyncpa [#allocation3 + $0x1], 0  ;;  %s1157_s15 = smov 0   ;;  %s1159_s16 = smov 0  }
   0x2   :  { %s1161_s17 = smov 0   ;;  %s1163_s18 = smov 0  }
   0x3 LB: > { %s1178_s19 = sadd.s32 4294967295, %s1127_s18   ;;  %s841_s20 = sadd.s32 4294967294, %s1127_s18   ;;  %s1127_s18 = sphi %s1163_s18, %s1346_s18   ;;  %s1123_s17 = sphi %s1161_s17, %s1345_s17   ;;  %s1119_s16 = sphi %s1159_s16, %s1344_s16   ;;  %s1115_s15 = sphi %s1157_s15, %s1343_s15  }
   0x4   : > { %s1182_s21 = sadd.s32 1, %s1127_s18   ;;  %s113_s22 = sadd.s32 1, %s1123_s17 }
   0x5   : > { %s110_s23 = ssub.s32 %s1127_s18, %s1182_s21  ;;  %p123_p0 = scmp.ne.s32.totalorder %s1123_s17, %s1119_s16 }
   0x6   : > { %p111_p1 = scmp.eq.s32.totalorder %s110_s23, 0  ;;  %p124_p2 = scmp.eq.s32.totalorder %s1178_s19, 1 }
   0x7   : > { %p129_p3 = scmp.ne.s32.totalorder %s1119_s16, %s1115_s15  ;;  %p130_p4 = scmp.eq.s32.totalorder %s841_s20, 1 }
   0x8   : > { %s1193_s24 = scalar_select %p111_p1, %s1123_s17, %s113_s22  }
   0x9   : > { %p1195_p5 = por %p124_p2, %p123_p0  ;;  %p1199_p6 = por %p130_p4, %p129_p3 }
   0xa   : > { %p844_p7 = scmp.ge.s32.totalorder %s1127_s18, 1  ;;  %p166_p8 = scmp.lt.s32.totalorder %s1127_s18, 3 }
   0xc   : > { %p167_p9 = pnand %p844_p7, %p166_p8 }
   0xd   : > { %v1047_v0 = vld [vmem:[%s1337_s1] sm:$0xff] (!%p167_p9)   ;;  %s846_s29 = sshll.u32 (!%p167_p9), %s1178_s19, 4  ;;  %v1048_v1 = vld [vmem:[%s1337_s1 + $0x8] sm:$0xff] (!%p167_p9)   ;;  %v1049_v2 = vld [vmem:[%s1337_s1 + $0x10] sm:$0xff] (!%p167_p9)   ;;  %vm288_vm0 = vcmask (!%p167_p9), 523264   ;;  %vm627_vm1 = vcmask (!%p167_p9), 261120  }
   0xe   : > { %170 = sbr.rel (%p167_p9) target bundleno = 724 (0x2d4), region = 36  ;;  %p193_p10 = scmp.lt.s32.totalorder (!%p167_p9), %s846_s29, 31  ;;  %930 = vmatprep.subr.bf16.mxu0 (!%p167_p9), %v1047_v0  ;;  %998 = vmatprep.subr.bf16.mxu1 (!%p167_p9), %v1047_v0  ;;  %v1050_v4 = vld [vmem:[%s1337_s1 + $0x18] sm:$0xff] (!%p167_p9)   ;;  %v1059_v5 = vld [vmem:[%s1338_s2] sm:$0xff] (!%p167_p9)   ;;  %v1060_v11 = vld [vmem:[%s1338_s2 + $0x8] sm:$0xff] (!%p167_p9)  }
   0xf   : > { %931 = vmatpush3.bf16.msra.mxu0 (!%p167_p9), %v1047_v0  ;;  %1002 = vmatpush3.bf16.msra.mxu1 (!%p167_p9), %v1047_v0  ;;  %v1061_v14 = vld [vmem:[%s1338_s2 + $0x10] sm:$0xff] (!%p167_p9)   ;;  %v1062_v15 = vld [vmem:[%s1338_s2 + $0x18] sm:$0xff] (!%p167_p9)   ;;  %v1063_v16 = vld [vmem:[%s1339_s3] sm:$0xff] (!%p167_p9)   ;;  %s189_s9 = sand.u32 (!%p167_p9), 1, %s1119_s16   ;;  %s895_s12 = sshll.u32 (!%p167_p9), %s1178_s19, 11 }
  0x10   : > { %932 = vmatprep.subr.bf16.mxu0 (!%p167_p9), %v1048_v1  ;;  %999 = vmatprep.subr.bf16.mxu1 (!%p167_p9), %v1048_v1  ;;  %v1064_v57 = vld [vmem:[%s1339_s3 + $0x8] sm:$0xff] (!%p167_p9)   ;;  %s845_s10 = sshll.u32 (!%p167_p9), %s189_s9, 7  ;;  %s1286_s22 = scalar_lea.hbm (!%p167_p9), %s1340_s4, %s895_s12 }
  0x11   : > { %s1295_s19 = scalar_lea.sflag (!%p167_p9), [#allocation3], %s189_s9  ;;  %s1129_s27 = smov (!%p167_p9), [#allocation2]  }
  0x12   : > { %s1069_s28 = sshll.u32 (!%p167_p9), %s1129_s27, 4  ;;  %s1070_s28 = int_to_ptr.vmem [resolvable:$false] %s1069_s28 }
  0x13   : > { %933 = vmatpush3.bf16.msra.mxu0 (!%p167_p9), %v1048_v1  ;;  %1003 = vmatpush3.bf16.msra.mxu1 (!%p167_p9), %v1048_v1 }
  0x14   : > { %934 = vmatprep.subr.bf16.mxu0 (!%p167_p9), %v1049_v2  ;;  %1000 = vmatprep.subr.bf16.mxu1 (!%p167_p9), %v1049_v2 }
  0x15   : > { %s1348_s29 = smov (!%p193_p10, %s846_s29), 31 }
  0x16   : > { %s847_s8 = sshll.u32 %s1348_s29, 2  ;;  %s1071_s29 = scalar_lea.vmem %s1070_s28, 4096 }
  0x17   : > { %s196_s11 = scalar_lea.vmem %s1336_s0, %s847_s8  ;;  %935 = vmatpush3.bf16.msra.mxu0 %v1049_v2  ;;  %1004 = vmatpush3.bf16.msra.mxu1 %v1049_v2 }
  0x18   : > { %v1051_v3 = vld [vmem:[%s196_s11] sm:$0xff]   ;;  %936 = vmatprep.subr.bf16.mxu0 %v1050_v4  ;;  %v1052_v7 = vld [vmem:[%s196_s11 + $0x8] sm:$0xff]   ;;  %1001 = vmatprep.subr.bf16.mxu1 %v1050_v4  ;;  %v1053_v8 = vld [vmem:[%s196_s11 + $0x10] sm:$0xff]  }
  0x19   : > { %938 = vmatprep.mubr.msk.bf16.mxu0 %vm288_vm0, %v1051_v3  ;;  %v1055_v6 = vld [vmem:[%s196_s11 + $0x20] sm:$0xff]   ;;  %v1056_v9 = vld [vmem:[%s196_s11 + $0x28] sm:$0xff]   ;;  %v1057_v10 = vld [vmem:[%s196_s11 + $0x30] sm:$0xff]  }
  0x1a   : > { %946 = vmatprep.mubr.msk.bf16.mxu1 %vm288_vm0, %v1055_v6  ;;  %v1054_v12 = vld [vmem:[%s196_s11 + $0x18] sm:$0xff]  }
  0x1b   : > { %937 = vmatpush3.bf16.msra.mxu0 %v1050_v4  ;;  %1005 = vmatpush3.bf16.msra.mxu1 %v1050_v4  ;;  %v1058_v13 = vld [vmem:[%s196_s11 + $0x38] sm:$0xff]   ;;  %s1266_s11 = scalar_lea.vmem [#allocation2], %s845_s10 }
  0x1c   : > { %954 = vmatprep.subr.bf16.mxu1 %v1059_v5  ;;  %978 = vmatprep.subr.bf16.mxu0 %v1063_v16  ;;  %s779_s13 = sshll.u32 %s1266_s11, 4  ;;  %s1288_s13 = int_to_ptr.vmem [resolvable:$true] %s779_s13 }
  0x1d   : > { %s1065_s23 = scalar_lea.vmem %s1288_s13, 2048  ;;  %p1072_p0 = scmp.lt.s32.totalorder %s1288_s13, %s1070_s28 }
  0x1e   : > { %939 = vmatmul.mubr.msk.bf16.vlgmr.msra.gmra.mrb[0].mxu0 %vm288_vm0, %v1052_v7  ;;  %947 = vmatmul.mubr.msk.bf16.vlgmr.msra.gmra.mrb[0].mxu1 %vm288_vm0, %v1056_v9  ;;  %p1066_p11 = scmp.ne.s32.totalorder %s1288_s13, %s1065_s23  ;;  %p1073_p1 = scmp.lt.s32.totalorder %s1071_s29, %s1065_s23 }
  0x1f   : > { %942 = vmatprep.mubr.msk.bf16.mxu0 %vm288_vm0, %v1053_v8  ;;  %950 = vmatprep.mubr.msk.bf16.mxu1 %vm288_vm0, %v1057_v10 }
  0x20   : > { %955 = vmatpush3.bf16.msra.mxu1 %v1059_v5  ;;  %979 = vmatpush3.bf16.msra.mxu0 %v1063_v16  ;;  %p1067_p12 = pnand %p1066_p11, %p1195_p5  ;;  %p1074_p2 = por %p1073_p1, %p1072_p0 }
  0x21   : > { %956 = vmatprep.subr.bf16.mxu1 %v1060_v11  ;;  %980 = vmatprep.subr.bf16.mxu0 %v1064_v57 }
  0x22   : > { %p1068_p13 = pneg %p1067_p12 }
  0x24   : > { %957 = vmatpush3.bf16.msra.mxu1 %v1060_v11  ;;  %981 = vmatpush3.bf16.msra.mxu0 %v1064_v57  ;;  %p1075_p3 = pnand %p1074_p2, %p1068_p13 }
  0x25   : > { %958 = vmatprep.subr.bf16.mxu1 %v1061_v14 }
  0x26   : > { %943 = vmatmul.mubr.msk.bf16.gmra.mrb[4].mxu0 %vm288_vm0, %v1054_v12  ;;  %951 = vmatmul.mubr.msk.bf16.gmra.mrb[4].mxu1 %vm288_vm0, %v1058_v13 }
  0x28   : > { %959 = vmatpush3.bf16.msra.mxu1 %v1061_v14 }
  0x29   : > { %960 = vmatprep.subr.bf16.mxu1 %v1062_v15 }
  0x2c   : > { %961 = vmatpush3.bf16.msra.mxu1 %v1062_v15 }
  0xf1   : > { %v940_v17 = vpop.f32.mrb[0].mxu0  ;;  %v948_v18 = vpop.f32.mrb[0].mxu1 }
  0xf2   : > { %v347_v19 = vpop.f32.mrb[1].mxu0  ;;  %v420_v20 = vmax.f32 %v948_v18, 0.0  ;;  %v379_v21 = vpop.f32.mrb[1].mxu1  ;;  %v412_v25 = vmax.f32 %v940_v17, 0.0 }
  0xf3   : > { %v941_v22 = vpop.f32.mrb[2].mxu0  ;;  %v418_v23 = vmax.f32 %v379_v21, 0.0  ;;  %v949_v24 = vpop.f32.mrb[2].mxu1  ;;  %v410_v30 = vmax.f32 %v347_v19, 0.0 }
  0xf4   : > { %v413_v26 = vmax.f32 %v941_v22, 0.0  ;;  %v350_v27 = vpop.f32.mrb[3].mxu0  ;;  %v421_v28 = vmax.f32 %v949_v24, 0.0  ;;  %v382_v29 = vpop.f32.mrb[3].mxu1 }
  0xf5   : > { %v411_v31 = vmax.f32 %v350_v27, 0.0  ;;  %v419_v32 = vmax.f32 %v382_v29, 0.0 }
  0xf6   : > { %v427_v33 = vpack.c.bf16 %v413_v26, %v412_v25  ;;  %v431_v34 = vpack.c.bf16 %v421_v28, %v420_v20 }
  0xf7   : > { %v426_v35 = vpack.c.bf16 %v411_v31, %v410_v30  ;;  %v430_v36 = vpack.c.bf16 %v419_v32, %v418_v23 }
  0xf9   : > { %v944_v37 = vpop.f32.mrb[4].mxu0  ;;  %962 = vmatprep.mubr.msk.bf16.mxu1 %vm288_vm0, %v426_v35  ;;  %v952_v38 = vpop.f32.mrb[4].mxu1 }
  0xfa   : > { %v363_v39 = vpop.f32.mrb[5].mxu0  ;;  %963 = vmatmul.mubr.msk.bf16.vlgmr.msra.gmra.mrb[8].mxu1 %vm288_vm0, %v427_v33  ;;  %v424_v40 = vmax.f32 %v952_v38, 0.0  ;;  %v395_v41 = vpop.f32.mrb[5].mxu1  ;;  %v416_v45 = vmax.f32 %v944_v37, 0.0 }
  0xfb   : > { %v945_v42 = vpop.f32.mrb[6].mxu0  ;;  %v422_v43 = vmax.f32 %v395_v41, 0.0  ;;  %v953_v44 = vpop.f32.mrb[6].mxu1  ;;  %v414_v50 = vmax.f32 %v363_v39, 0.0 }
  0xfc   : > { %v417_v46 = vmax.f32 %v945_v42, 0.0  ;;  %v366_v47 = vpop.f32.mrb[7].mxu0  ;;  %v425_v48 = vmax.f32 %v953_v44, 0.0  ;;  %v398_v49 = vpop.f32.mrb[7].mxu1 }
  0xfd   : > { %v415_v51 = vmax.f32 %v366_v47, 0.0  ;;  %v423_v52 = vmax.f32 %v398_v49, 0.0 }
  0xfe   : > { %v429_v53 = vpack.c.bf16 %v417_v46, %v416_v45  ;;  %v433_v54 = vpack.c.bf16 %v425_v48, %v424_v40 }
  0xff   : > { %v428_v55 = vpack.c.bf16 %v415_v51, %v414_v50  ;;  %v432_v56 = vpack.c.bf16 %v423_v52, %v422_v43 }
 0x101   : > { %966 = vmatprep.mubr.msk.bf16.mxu1 %vm288_vm0, %v428_v55 }
 0x102   : > { %967 = vmatmul.mubr.msk.bf16.gmra.mrb[12].mxu1 %vm288_vm0, %v429_v53 }
 0x103   : > { %970 = vmatprep.mubr.msk.bf16.mxu1 %vm288_vm0, %v430_v36 }
 0x10a   : > { %971 = vmatmul.mubr.msk.bf16.gmra.mrb[16].mxu1 %vm288_vm0, %v431_v34 }
 0x10b   : > { %974 = vmatprep.mubr.msk.bf16.mxu1 %vm288_vm0, %v432_v56 }
 0x112   : > { %975 = vmatmul.mubr.msk.bf16.gmra.mrb[20].mxu1 %vm288_vm0, %v433_v54 }
 0x1cd   : > { %v964_v58 = vpop.f32.mrb[8].mxu1 }
 0x1ce   : > { %v524_v59 = vpop.f32.mrb[9].mxu1  ;;  %v589_v61 = vmax.f32 %v964_v58, 0.0 }
 0x1cf   : > { %v965_v60 = vpop.f32.mrb[10].mxu1  ;;  %v587_v0 = vmax.f32 %v524_v59, 0.0 }
 0x1d0   : > { %v590_v62 = vmax.f32 %v965_v60, 0.0  ;;  %v527_v63 = vpop.f32.mrb[11].mxu1 }
 0x1d1   : > { %v588_v1 = vmax.f32 %v527_v63, 0.0 }
 0x1d2   : > { %v604_v2 = vpack.c.bf16 %v590_v62, %v589_v61 }
 0x1d3   : > { %v603_v3 = vpack.c.bf16 %v588_v1, %v587_v0 }
 0x1d5   : > { %v968_v4 = vpop.f32.mrb[12].mxu1  ;;  %982 = vmatprep.mubr.msk.bf16.mxu0 %vm627_vm1, %v603_v3 }
 0x1d6   : > { %v540_v5 = vpop.f32.mrb[13].mxu1  ;;  %983 = vmatmul.mubr.msk.bf16.vlgmr.msra.gmra.mrb[8].mxu0 %vm627_vm1, %v604_v2  ;;  %v593_v7 = vmax.f32 %v968_v4, 0.0 }
 0x1d7   : > { %v969_v6 = vpop.f32.mrb[14].mxu1  ;;  %v591_v10 = vmax.f32 %v540_v5, 0.0 }
 0x1d8   : > { %v594_v8 = vmax.f32 %v969_v6, 0.0  ;;  %v543_v9 = vpop.f32.mrb[15].mxu1 }
 0x1d9   : > { %v592_v11 = vmax.f32 %v543_v9, 0.0 }
 0x1da   : > { %v606_v12 = vpack.c.bf16 %v594_v8, %v593_v7 }
 0x1db   : > { %v605_v13 = vpack.c.bf16 %v592_v11, %v591_v10 }
 0x1dd   : > { %v972_v14 = vpop.f32.mrb[16].mxu1  ;;  %986 = vmatprep.mubr.msk.bf16.mxu0 %vm627_vm1, %v605_v13 }
 0x1de   : > { %v556_v15 = vpop.f32.mrb[17].mxu1  ;;  %987 = vmatmul.mubr.msk.bf16.gmra.mrb[12].mxu0 %vm627_vm1, %v606_v12  ;;  %v597_v17 = vmax.f32 %v972_v14, 0.0 }
 0x1df   : > { %v973_v16 = vpop.f32.mrb[18].mxu1  ;;  %v595_v20 = vmax.f32 %v556_v15, 0.0 }
 0x1e0   : > { %v598_v18 = vmax.f32 %v973_v16, 0.0  ;;  %v559_v19 = vpop.f32.mrb[19].mxu1 }
 0x1e1   : > { %v596_v21 = vmax.f32 %v559_v19, 0.0 }
 0x1e2   : > { %v608_v22 = vpack.c.bf16 %v598_v18, %v597_v17 }
 0x1e3   : > { %v607_v23 = vpack.c.bf16 %v596_v21, %v595_v20 }
 0x1e5   : > { %v976_v24 = vpop.f32.mrb[20].mxu1  ;;  %990 = vmatprep.mubr.msk.bf16.mxu0 %vm627_vm1, %v607_v23 }
 0x1e6   : > { %v572_v25 = vpop.f32.mrb[21].mxu1  ;;  %991 = vmatmul.mubr.msk.bf16.gmra.mrb[16].mxu0 %vm627_vm1, %v608_v22  ;;  %v601_v27 = vmax.f32 %v976_v24, 0.0 }
 0x1e7   : > { %v977_v26 = vpop.f32.mrb[22].mxu1  ;;  %v599_v30 = vmax.f32 %v572_v25, 0.0 }
 0x1e8   : > { %v602_v28 = vmax.f32 %v977_v26, 0.0  ;;  %v575_v29 = vpop.f32.mrb[23].mxu1 }
 0x1e9   : > { %v600_v31 = vmax.f32 %v575_v29, 0.0 }
 0x1ea   : > { %v610_v32 = vpack.c.bf16 %v602_v28, %v601_v27 }
 0x1eb   : > { %v609_v33 = vpack.c.bf16 %v600_v31, %v599_v30 }
 0x1ed   : > { %994 = vmatprep.mubr.msk.bf16.mxu0 %vm627_vm1, %v609_v33 }
 0x1ee   : > { %995 = vmatmul.mubr.msk.bf16.gmra.mrb[20].mxu0 %vm627_vm1, %v610_v32 }
 0x2a9   : > { %v984_v34 = vpop.f32.mrb[8].mxu0 }
 0x2aa   : > { %751 = vst [vmem:[%s1266_s11 + $0x10] sm:$0xff] %v984_v34  ;;  %v686_v35 = vpop.f32.mrb[9].mxu0 }
 0x2ab   : > { %749 = vst [vmem:[%s1266_s11] sm:$0xff] %v686_v35  ;;  %v985_v36 = vpop.f32.mrb[10].mxu0 }
 0x2ac   : > { %752 = vst [vmem:[%s1266_s11 + $0x18] sm:$0xff] %v985_v36  ;;  %v689_v37 = vpop.f32.mrb[11].mxu0 }
 0x2ad   : > { %750 = vst [vmem:[%s1266_s11 + $0x8] sm:$0xff] %v689_v37 }
 0x2b1   : > { %v988_v38 = vpop.f32.mrb[12].mxu0 }
 0x2b2   : > { %755 = vst [vmem:[%s1266_s11 + $0x30] sm:$0xff] %v988_v38  ;;  %v702_v39 = vpop.f32.mrb[13].mxu0 }
 0x2b3   : > { %753 = vst [vmem:[%s1266_s11 + $0x20] sm:$0xff] %v702_v39  ;;  %v989_v40 = vpop.f32.mrb[14].mxu0 }
 0x2b4   : > { %756 = vst [vmem:[%s1266_s11 + $0x38] sm:$0xff] %v989_v40  ;;  %v705_v41 = vpop.f32.mrb[15].mxu0 }
 0x2b5   : > { %754 = vst [vmem:[%s1266_s11 + $0x28] sm:$0xff] %v705_v41 }
 0x2b9   : > { %v992_v42 = vpop.f32.mrb[16].mxu0 }
 0x2ba   : > { %759 = vst [vmem:[%s1266_s11 + $0x50] sm:$0xff] %v992_v42  ;;  %v718_v43 = vpop.f32.mrb[17].mxu0 }
 0x2bb   : > { %757 = vst [vmem:[%s1266_s11 + $0x40] sm:$0xff] %v718_v43  ;;  %v993_v44 = vpop.f32.mrb[18].mxu0 }
 0x2bc   : > { %760 = vst [vmem:[%s1266_s11 + $0x58] sm:$0xff] %v993_v44  ;;  %v721_v45 = vpop.f32.mrb[19].mxu0 }
 0x2bd   : > { %758 = vst [vmem:[%s1266_s11 + $0x48] sm:$0xff] %v721_v45 }
 0x2c1   : > { %v996_v46 = vpop.f32.mrb[20].mxu0 }
 0x2c2   : > { %763 = vst [vmem:[%s1266_s11 + $0x70] sm:$0xff] %v996_v46  ;;  %v734_v47 = vpop.f32.mrb[21].mxu0 }
 0x2c3   : > { %761 = vst [vmem:[%s1266_s11 + $0x60] sm:$0xff] %v734_v47  ;;  %v997_v48 = vpop.f32.mrb[22].mxu0 }
 0x2c4   : > { %764 = vst [vmem:[%s1266_s11 + $0x78] sm:$0xff] %v997_v48  ;;  %v737_v49 = vpop.f32.mrb[23].mxu0 }
 0x2c5   : > { %762 = vst [vmem:[%s1266_s11 + $0x68] sm:$0xff] %v737_v49 }
 0x2c6   : > { %1078 = shalt.err (!%p1075_p3)
}
 0x2c7   : > { %s1079_s30 = scalar_lea.hbm %s1286_s22, 2048  ;;  %s1083_s7 = scalar_lea.hbm %s1340_s4, 4096 }
 0x2c8   : > { %p1080_p4 = scmp.ne.s32.totalorder %s1286_s22, %s1079_s30  ;;  %p1084_p9 = scmp.lt.u32.totalorder %s1286_s22, %s1340_s4 }
 0x2c9   : > { %p1085_p10 = scmp.lt.u32.totalorder %s1083_s7, %s1079_s30  ;;  %p1087_p12 = scmp.lt.u32.totalorder %s1079_s30, %s1286_s22 }
 0x2ca   : > { %p1081_p7 = pnand %p1080_p4, %p1195_p5 }
 0x2cb   : > { %p1086_p11 = por %p1085_p10, %p1084_p9 }
 0x2cc   : > { %p1082_p8 = pneg %p1081_p7 }
 0x2cd   : > { %p1088_p13 = por %p1087_p12, %p1086_p11 }
 0x2cf   : > { %p1089_p0 = pnand %p1088_p13, %p1082_p8 }
 0x2d1   : > { %1092 = shalt.err (!%p1089_p0)
}
 0x2d2   : > { %s1130_s10 = smov 128   ;;  %s1131_s11 = smov 8  }
 0x2d3   : > { %1006 = dma.vmem_to_hbm [thread:$0]  (%p1195_p5), %s1288_s13, 2048, %s1286_s22, %s1295_s19, %s1130_s10, %s1130_s10, %s1131_s11  }
 0x2d4 PF: > { %p1012_p1 = scmp.ge.s32.totalorder %s1127_s18, 2  ;;  %s794_s12 = sand.u32 1, %s1115_s15  }
 0x2d5   : > { %s795_s14 = scalar_lea.sflag [#allocation3], %s794_s12 }
 0x2d6   : > { %p1009_p2 = pnand %p1012_p1, %p1199_p6 }
 0x2d8   : > { %1110 = dma.done.wait (!%p1009_p2), %s795_s14, 2048  }
 0x2d9   : > { %1112 = vsyncadd (!%p1009_p2), %s795_s14, 4294965248  ;;  %p14_p3 = scmp.ge.s32.totalorder %s1182_s21, 4   ;;  %s1343_s15 = smov %s1119_s16 }
 0x2da   : > { %s1344_s16 = smov %s1123_s17  ;;  %s1345_s17 = smov %s1193_s24 }
 0x2db   : > { %s1346_s18 = smov %s1182_s21  ;;  %16 = sbr.rel (!%p14_p3) target bundleno = 3 (0x3), region = 71 }
 0x2e2   :  { %800 = vsyncpa [#allocation3], 1 }
 0x2e3   :  { %802 = vsyncpa [#allocation3 + $0x1], 1 }

// kernel: robust_pprgo_forward.3
= control target key start
LH: loop header
LB: loop body
LE: loop exit
PB: predicated region body
PF: predicated region fallthrough
CT: control target
= control target key end

     0   :  { %10 = vsyncpa [#allocation8], 0  ;;  %s2739_s0 = inlined_call_operand.hbm [shape: f32[8,256], index: 0, kind: input, shape index: {}, may-alias: {0,1}]   ;;  %s2740_s1 = inlined_call_operand.hbm [shape: f32[8,256], index: 1, kind: input, shape index: {}, may-alias: {0,1}]   ;;  %s2741_s2 = inlined_call_operand.hbm [shape: f32[8,1], index: 2, kind: input, shape index: {}]   ;;  %s2742_s3 = inlined_call_operand.hbm [shape: f32[256,128], index: 3, kind: input, shape index: {}, may-alias: {3,4}]   ;;  %s2743_s4 = inlined_call_operand.hbm [shape: f32[256,128], index: 4, kind: input, shape index: {}, may-alias: {3,4}]   ;;  %s2744_s5 = inlined_call_operand.hbm [shape: f32[8,128], index: 5, kind: output, shape index: {}]  }
   0x1   :  { %11 = vsyncpa [#allocation11], 0 }
   0x2   :  { %13 = vsyncpa [#allocation11 + $0x1], 0 }
   0x3   :  { %14 = vsyncpa [#allocation14], 0 }
   0x4   :  { %15 = vsyncpa [#allocation9], 0  ;;  %s1931_s18 = smov 0   ;;  %s1933_s19 = smov 0  }
   0x5   :  { %s1935_s20 = smov 0   ;;  %s1937_s21 = smov 0  }
   0x6 LB: > { %s1950_s22 = sadd.s32 4294967295, %s1884_s21   ;;  %p62_p0 = scmp.ne.s32.totalorder %s1876_s19, %s1872_s18  ;;  %s1884_s21 = sphi %s1937_s21, %s2767_s21   ;;  %s1880_s20 = sphi %s1935_s20, %s2766_s20   ;;  %s1876_s19 = sphi %s1933_s19, %s2765_s19   ;;  %s1872_s18 = sphi %s1931_s18, %s2764_s18  }
   0x7   : > { %p2745_p1 = scmp.eq.s32.totalorder %s1950_s22, 0  ;;  %p1411_p2 = scmp.ge.s32.totalorder %s1884_s21, 1 }
   0x8   : > { %p162_p3 = scmp.lt.s32.totalorder %s1884_s21, 3  ;;  %s1886_s25 = smov [#allocation7]  }
   0x9   : > { %p1959_p5 = por %p2745_p1, %p62_p0  ;;  %s175_s26 = sshll.u32 %s1886_s25, 4  ;;  %s176_s26 = int_to_ptr.vmem [resolvable:$true] %s175_s26 }
   0xa   : > { %p1963_p6 = pnand %p1411_p2, %p162_p3  ;;  %s1887_s27 = smov [#allocation12]  }
   0xb   : > { %s2748_s23 = scalar_select %p1959_p5, 1, 0 }
   0xc   : > { %s2749_s24 = scalar_select %p1963_p6, 1, 0 }
   0xd   : > { %p1515_p7 = pneg %p1963_p6  ;;  %s186_s28 = sshll.u32 %s1887_s27, 4  ;;  %s1975_s28 = int_to_ptr.vmem [resolvable:$true] %s186_s28 }
   0xe   : > { %s1888_s30 = smov [#allocation13]   ;;  %s1660_s9 = scalar_lea.hbm %s2739_s0, 256 }
   0xf   : > { %p1971_p8 = pnand %p1515_p7, %p2745_p1  ;;  %s196_s6 = sshll.u32 %s1888_s30, 4  ;;  %s1977_s6 = int_to_ptr.vmem [resolvable:$true] %s196_s6 }
  0x10   : > { %p1661_p9 = scmp.ne.s32.totalorder %s2739_s0, %s1660_s9  ;;  %p1667_p13 = scmp.lt.u32.totalorder %s1660_s9, %s2739_s0 }
  0x11   : > { %p1987_p10 = pneg %p1971_p8 }
  0x13   : > { %p1663_p11 = pnand %p1987_p10, %p1661_p9 }
  0x15   : > { %p1664_p12 = pneg %p1663_p11 }
  0x17   : > { %p1669_p0 = pnand %p1667_p13, %p1664_p12 }
  0x19   : > { %1672 = shalt.err (!%p1669_p0)
}
  0x1a   : > { %s1673_s15 = scalar_lea.vmem %s176_s26, 256  ;;  %p1681_p4 = scmp.lt.s32.totalorder %s176_s26, %s176_s26 }
  0x1b   : > { %p1674_p2 = scmp.ne.s32.totalorder %s176_s26, %s1673_s15  ;;  %p1682_p1 = scmp.lt.s32.totalorder %s1673_s15, %s1673_s15 }
  0x1d   : > { %p1676_p3 = pnand %p1674_p2, %p1987_p10  ;;  %p1683_p5 = por %p1682_p1, %p1681_p4 }
  0x1f   : > { %p1677_p7 = pneg %p1676_p3 }
  0x21   : > { %p1684_p6 = pnand %p1683_p5, %p1677_p7 }
  0x23   : > { %1687 = shalt.err (!%p1684_p6)
}
  0x24   : > { %1518 = dma.hbm_to_vmem [thread:$0]  (!%p1971_p8), %s2739_s0, 256, %s176_s26, [#allocation8]  }
  0x25   : > { %s1688_s27 = scalar_lea.hbm %s2741_s2, 128 }
  0x26   : > { %p1689_p9 = scmp.ne.s32.totalorder %s2741_s2, %s1688_s27  ;;  %p1695_p4 = scmp.lt.u32.totalorder %s1688_s27, %s2741_s2 }
  0x28   : > { %p1691_p11 = pnand %p1689_p9, %p1987_p10 }
  0x2a   : > { %p1692_p1 = pneg %p1691_p11 }
  0x2c   : > { %p1697_p5 = pnand %p1695_p4, %p1692_p1 }
  0x2e   : > { %1700 = shalt.err (!%p1697_p5)
}
  0x2f   : > { %s1701_s26 = scalar_lea.vmem %s1975_s28, 128  ;;  %p1709_p0 = scmp.lt.s32.totalorder %s1975_s28, %s1975_s28 }
  0x30   : > { %p1702_p6 = scmp.ne.s32.totalorder %s1975_s28, %s1701_s26  ;;  %p1710_p2 = scmp.lt.s32.totalorder %s1701_s26, %s1701_s26 }
  0x32   : > { %p1704_p12 = pnand %p1702_p6, %p1987_p10  ;;  %p1711_p3 = por %p1710_p2, %p1709_p0 }
  0x34   : > { %p1705_p13 = pneg %p1704_p12 }
  0x36   : > { %p1712_p7 = pnand %p1711_p3, %p1705_p13 }
  0x38   : > { %1715 = shalt.err (!%p1712_p7)
}
  0x39   : > { %1521 = dma.hbm_to_vmem [thread:$0]  (!%p1971_p8), %s2741_s2, 128, %s1975_s28, [#allocation11]  }
  0x3a   : > { %s1716_s15 = scalar_lea.hbm %s2742_s3, 4096 }
  0x3b   : > { %p1717_p9 = scmp.ne.s32.totalorder %s2742_s3, %s1716_s15  ;;  %p1723_p4 = scmp.lt.u32.totalorder %s1716_s15, %s2742_s3 }
  0x3d   : > { %p1719_p11 = pnand %p1717_p9, %p1987_p10 }
  0x3f   : > { %p1720_p1 = pneg %p1719_p11 }
  0x41   : > { %p1725_p5 = pnand %p1723_p4, %p1720_p1 }
  0x43   : > { %1728 = shalt.err (!%p1725_p5)
}
  0x44   : > { %s1729_s28 = scalar_lea.vmem %s1977_s6, 4096  ;;  %p1737_p0 = scmp.lt.s32.totalorder %s1977_s6, %s1977_s6 }
  0x45   : > { %p1730_p6 = scmp.ne.s32.totalorder %s1977_s6, %s1729_s28  ;;  %p1738_p2 = scmp.lt.s32.totalorder %s1729_s28, %s1729_s28 }
  0x47   : > { %p1732_p12 = pnand %p1730_p6, %p1987_p10  ;;  %p1739_p3 = por %p1738_p2, %p1737_p0 }
  0x49   : > { %p1733_p13 = pneg %p1732_p12 }
  0x4b   : > { %p1740_p7 = pnand %p1739_p3, %p1733_p13 }
  0x4d   : > { %1743 = shalt.err (!%p1740_p7)
}
  0x4e   : > { %s1889_s27 = smov 128   ;;  %s1890_s12 = smov 8  }
  0x4f   : > { %1524 = dma.hbm_to_vmem [thread:$0]  (!%p1971_p8), %s2742_s3, 4096, %s1977_s6, [#allocation14], %s1889_s27, %s1889_s27, %s1890_s12  }
  0x50   : > { %s2053_s8 = sadd.s32 1, %s1884_s21   ;;  %s49_s26 = sadd.s32 1, %s1880_s20 }
  0x51   : > { %s46_s9 = ssub.s32 %s1884_s21, %s2053_s8  ;;  %p56_p9 = scmp.ne.s32.totalorder %s1880_s20, %s1876_s19 }
  0x52   : > { %p47_p10 = scmp.eq.s32.totalorder %s46_s9, 0  ;;  %p57_p11 = scmp.eq.s32.totalorder %s1884_s21, 0 }
  0x53   : > { %p1535_p1 = scmp.lt.s32.totalorder %s1884_s21, 2  ;;  %s210_s29 = sand.u32 1, %s1884_s21  }
  0x54   : > { %s2063_s10 = scalar_select %p47_p10, %s1880_s20, %s49_s26  }
  0x55   : > { %p58_p4 = por %p57_p11, %p56_p9  ;;  %s212_s11 = sand.u32 1, %s1880_s20  }
  0x56   : > { %s1416_s13 = sshll.u32 %s212_s11, 3  ;;  %s1417_s14 = sshll.u32 %s1884_s21, 7 }
  0x57   : > { %s2071_s6 = scalar_lea.hbm %s2740_s1, %s1417_s14  ;;  %s214_s17 = scalar_lea.vmem [#allocation10], %s1416_s13 }
  0x58   : > { %s221_s18 = sshll.u32 %s214_s17, 4  ;;  %p2073_p8 = pnand %p1535_p1, %p58_p4  ;;  %s2077_s18 = int_to_ptr.vmem [resolvable:$true] %s221_s18 }
  0x59   : > { %s2079_s28 = sshll.u32 %s212_s11, 7  ;;  %s211_s30 = scalar_lea.sflag [#allocation11], %s210_s29 }
  0x5a   : > { %s1744_s7 = scalar_lea.hbm %s2071_s6, 128  ;;  %p1746_p6 = pneg %p2073_p8 }
  0x5b   : > { %p1745_p5 = scmp.ne.s32.totalorder %s2071_s6, %s1744_s7  ;;  %s1749_s13 = scalar_lea.hbm %s2740_s1, 256 }
  0x5c   : > { %p1750_p0 = scmp.lt.u32.totalorder %s2071_s6, %s2740_s1  ;;  %p1751_p2 = scmp.lt.u32.totalorder %s1749_s13, %s1744_s7 }
  0x5d   : > { %p1747_p12 = pnand %p1746_p6, %p1745_p5  ;;  %p1753_p7 = scmp.lt.u32.totalorder %s1744_s7, %s2071_s6 }
  0x5e   : > { %p1752_p3 = por %p1751_p2, %p1750_p0 }
  0x5f   : > { %p1748_p13 = pneg %p1747_p12 }
  0x60   : > { %p1754_p10 = por %p1753_p7, %p1752_p3 }
  0x62   : > { %p1755_p9 = pnand %p1754_p10, %p1748_p13 }
  0x64   : > { %1758 = shalt.err (!%p1755_p9)
}
  0x65   : > { %s1759_s11 = scalar_lea.vmem %s2077_s18, 128  ;;  %s1891_s16 = smov [#allocation10]  }
  0x66   : > { %p1760_p11 = scmp.ne.s32.totalorder %s2077_s18, %s1759_s11  ;;  %s1764_s17 = sshll.u32 %s1891_s16, 4  ;;  %s1765_s17 = int_to_ptr.vmem [resolvable:$false] %s1764_s17 }
  0x67   : > { %s1766_s9 = scalar_lea.vmem %s1765_s17, 256  ;;  %p1767_p5 = scmp.lt.s32.totalorder %s2077_s18, %s1765_s17 }
  0x68   : > { %p1762_p1 = pnand %p1760_p11, %p1746_p6  ;;  %p1768_p12 = scmp.lt.s32.totalorder %s1766_s9, %s1759_s11 }
  0x6a   : > { %p1763_p4 = pneg %p1762_p1  ;;  %p1769_p0 = por %p1768_p12, %p1767_p5 }
  0x6c   : > { %p1770_p2 = pnand %p1769_p0, %p1763_p4 }
  0x6e   : > { %1773 = shalt.err (!%p1770_p2)
}
  0x6f   : > { %1528 = dma.hbm_to_vmem [thread:$0]  (!%p2073_p8), %s2071_s6, 128, %s2077_s18, %s211_s30  }
  0x70   : > { %s1433_s7 = sshll.u32 %s1884_s21, 11  ;;  %s232_s26 = scalar_lea.vmem [#allocation15], %s2079_s28 }
  0x71   : > { %s239_s13 = sshll.u32 %s232_s26, 4  ;;  %s2113_s16 = scalar_lea.hbm %s2743_s4, %s1433_s7  ;;  %s2115_s13 = int_to_ptr.vmem [resolvable:$true] %s239_s13 }
  0x72   : > { %s2119_s11 = scalar_lea.sflag [#allocation8], %s210_s29  ;;  %s1774_s17 = scalar_lea.hbm %s2113_s16, 2048 }
  0x73   : > { %p1775_p13 = scmp.ne.s32.totalorder %s2113_s16, %s1774_s17  ;;  %s1779_s28 = scalar_lea.hbm %s2743_s4, 4096 }
  0x74   : > { %p1780_p10 = scmp.lt.u32.totalorder %s2113_s16, %s2743_s4  ;;  %p1781_p9 = scmp.lt.u32.totalorder %s1779_s28, %s1774_s17 }
  0x75   : > { %p1777_p3 = pnand %p1775_p13, %p1746_p6  ;;  %p1783_p1 = scmp.lt.u32.totalorder %s1774_s17, %s2113_s16 }
  0x76   : > { %p1782_p11 = por %p1781_p9, %p1780_p10 }
  0x77   : > { %p1778_p7 = pneg %p1777_p3 }
  0x78   : > { %p1784_p4 = por %p1783_p1, %p1782_p11 }
  0x7a   : > { %p1785_p5 = pnand %p1784_p4, %p1778_p7 }
  0x7c   : > { %1788 = shalt.err (!%p1785_p5)
}
  0x7d   : > { %s1789_s21 = scalar_lea.vmem %s2115_s13, 2048  ;;  %s1892_s29 = smov [#allocation15]  }
  0x7e   : > { %p1790_p12 = scmp.ne.s32.totalorder %s2115_s13, %s1789_s21  ;;  %s1794_s7 = sshll.u32 %s1892_s29, 4  ;;  %s1795_s7 = int_to_ptr.vmem [resolvable:$false] %s1794_s7 }
  0x7f   : > { %s1796_s26 = scalar_lea.vmem %s1795_s7, 4096  ;;  %p1797_p13 = scmp.lt.s32.totalorder %s2115_s13, %s1795_s7 }
  0x80   : > { %p1792_p0 = pnand %p1790_p12, %p1746_p6  ;;  %p1798_p3 = scmp.lt.s32.totalorder %s1796_s26, %s1789_s21 }
  0x82   : > { %p1793_p2 = pneg %p1792_p0  ;;  %p1799_p10 = por %p1798_p3, %p1797_p13 }
  0x84   : > { %p1800_p9 = pnand %p1799_p10, %p1793_p2 }
  0x86   : > { %1803 = shalt.err (!%p1800_p9)
}
  0x87   : > { %1531 = dma.hbm_to_vmem [thread:$0]  (!%p2073_p8), %s2113_s16, 2048, %s2115_s13, %s2119_s11, %s1889_s27, %s1889_s27, %s1890_s12  }
  0x88   : > { %p2753_p6 = scmp.ne.s32.totalorder %s2749_s24, 0 }
  0x89   : > { %p2754_p7 = scmp.eq.s32.totalorder (!%p2753_p6), %s1950_s22, 0 }
  0x8a   : > { %251 = sbr.rel (%p2753_p6) target bundleno = 1657 (0x679), region = 40 }
  0x91   : > { %1847 = dma.done.wait (%p2754_p7), [#allocation8], 256   ;;  %p2755_p11 = pmov %p2754_p7 }
  0x92   : > { %s257_s25 = sand.u32 1, %s1950_s22   ;;  %s259_s14 = sand.u32 1, %s1876_s19  }
  0x93   : > { %1849 = vsyncadd (%p2755_p11), [#allocation8], 4294967040  ;;  %s2156_s15 = sshll.u32 %s259_s14, 3  ;;  %s258_s17 = scalar_lea.sflag [#allocation11], %s257_s25 }
  0x94   : > { %s261_s6 = scalar_lea.vmem [#allocation10], %s2156_s15  ;;  %p2756_p8 = scmp.ne.s32.totalorder %s2748_s23, 0 }
  0x96   : > { %1851 = dma.done.wait (%p2756_p8), %s258_s17, 128  }
  0x97   : > { %1853 = vsyncadd (%p2756_p8), %s258_s17, 4294967168  ;;  %p2757_p1 = pmov %p2754_p7 }
  0x99   : > { %1855 = dma.done.wait (%p2757_p1), [#allocation11], 128   ;;  %p2758_p4 = pmov %p2757_p1 }
  0x9a   : > { %p2759_p5 = pmov %p2757_p1 }
  0x9b   : > { %1857 = vsyncadd (%p2758_p4), [#allocation11], 4294967168 }
  0x9c   : > { %1859 = dma.done.wait (%p2759_p5), [#allocation14], 4096   ;;  %p2760_p12 = pmov %p2757_p1 }
  0x9d   : > { %s1426_s24 = sshll.u32 %s259_s14, 7  ;;  %s275_s27 = scalar_lea.sflag [#allocation8], %s257_s25 }
  0x9e   : > { %1861 = vsyncadd (%p2760_p12), [#allocation14], 4294963200  ;;  %s2171_s12 = scalar_lea.vmem [#allocation15], %s1426_s24 }
  0x9f   : > { %1863 = dma.done.wait (%p2756_p8), %s275_s27, 2048  }
  0xa0   : > { %1865 = vsyncadd (%p2756_p8), %s275_s27, 4294965248  ;;  %p2761_p0 = scmp.ne.s32.totalorder %s1950_s22, 0 }
  0xa1   : > { %v317_v0 = vld [vmem:[#allocation13 + $0x10] sm:$0xff] (!%p2761_p0)  ;;  %v318_v1 = vld [vmem:[#allocation13 + $0x18] sm:$0xff] (!%p2761_p0)  ;;  %v315_v2 = vld [vmem:[#allocation13] sm:$0xff] (!%p2761_p0)  ;;  %vm311_vm0 = vcmask (!%p2761_p0), 7168  }
  0xa2   : > { %310 = sbr.rel (%p2761_p0) target bundleno = 446 (0x1be), region = 64  ;;  %v381_v3 = vmul.f32 (!%p2761_p0), %v317_v0, %v317_v0  ;;  %v348_v4 = vpack.c.bf16 (!%p2761_p0), %v318_v1, %v317_v0  ;;  %v316_v5 = vld [vmem:[#allocation13 + $0x8] sm:$0xff] (!%p2761_p0)  ;;  %v379_v6 = vmul.f32 (!%p2761_p0), %v315_v2, %v315_v2  ;;  %v331_v7 = vld [vmem:[#allocation13 + $0x80] sm:$0xff] (!%p2761_p0)  ;;  %v333_v11 = vld [vmem:[#allocation13 + $0x90] sm:$0xff] (!%p2761_p0)  ;;  %v382_v42 = vmul.f32 (!%p2761_p0), %v318_v1, %v318_v1 }
  0xa3   : > { %v332_v8 = vld [vmem:[#allocation13 + $0x88] sm:$0xff] (!%p2761_p0)  ;;  %v347_v9 = vpack.c.bf16 (!%p2761_p0), %v316_v5, %v315_v2  ;;  %v334_v12 = vld [vmem:[#allocation13 + $0x98] sm:$0xff] (!%p2761_p0)  ;;  %v395_v13 = vmul.f32 (!%p2761_p0), %v331_v7, %v331_v7  ;;  %v380_v14 = vmul.f32 (!%p2761_p0), %v316_v5, %v316_v5  ;;  %v335_v16 = vld [vmem:[#allocation13 + $0xa0] sm:$0xff] (!%p2761_p0)  ;;  %v397_v30 = vmul.f32 (!%p2761_p0), %v333_v11, %v333_v11 }
  0xa4   : > { %v355_v10 = vpack.c.bf16 (!%p2761_p0), %v332_v8, %v331_v7  ;;  %415 = vadd.xlane.f32.xlu1 (!%p2761_p0), %v381_v3  ;;  %364 = vst [vmem:[#allocation5 + $0x8] sm:$0xff] (!%p2761_p0), %v348_v4  ;;  %411 = vadd.xlane.f32.xlu0 (!%p2761_p0), %v379_v6  ;;  %v356_v15 = vpack.c.bf16 (!%p2761_p0), %v334_v12, %v333_v11  ;;  %v2179_v17 = vld [vmem:[#allocation13 + $0xa8] sm:$0xff] (!%p2761_p0)  ;;  %v319_v18 = vld [vmem:[#allocation13 + $0x20] sm:$0xff] (!%p2761_p0)  ;;  %v337_v21 = vld [vmem:[#allocation13 + $0xb0] sm:$0xff] (!%p2761_p0) }
  0xa5   : > { %363 = vst [vmem:[#allocation5] sm:$0xff] (!%p2761_p0), %v347_v9  ;;  %v357_v19 = vpack.c.bf16 (!%p2761_p0), %v2179_v17, %v335_v16  ;;  %v320_v20 = vld [vmem:[#allocation13 + $0x28] sm:$0xff] (!%p2761_p0)  ;;  %v321_v23 = vld [vmem:[#allocation13 + $0x30] sm:$0xff] (!%p2761_p0)  ;;  %v338_v24 = vld [vmem:[#allocation13 + $0xb8] sm:$0xff] (!%p2761_p0)  ;;  %v396_v29 = vmul.f32 (!%p2761_p0), %v332_v8, %v332_v8  ;;  %v398_v47 = vmul.f32 (!%p2761_p0), %v334_v12, %v334_v12  ;;  %v399_v56 = vmul.f32 (!%p2761_p0), %v335_v16, %v335_v16 }
  0xa6   : > { %371 = vst [vmem:[#allocation5 + $0x40] sm:$0xff] (!%p2761_p0), %v355_v10  ;;  %372 = vst [vmem:[#allocation5 + $0x48] sm:$0xff] (!%p2761_p0), %v356_v15  ;;  %v349_v22 = vpack.c.bf16 (!%p2761_p0), %v320_v20, %v319_v18  ;;  %v322_v25 = vld [vmem:[#allocation13 + $0x38] sm:$0xff] (!%p2761_p0)  ;;  %v358_v26 = vpack.c.bf16 (!%p2761_p0), %v338_v24, %v337_v21  ;;  %v339_v28 = vld [vmem:[#allocation13 + $0xc0] sm:$0xff] (!%p2761_p0)  ;;  %v383_v57 = vmul.f32 (!%p2761_p0), %v319_v18, %v319_v18 }
  0xa7   : > { %373 = vst [vmem:[#allocation5 + $0x50] sm:$0xff] (!%p2761_p0), %v357_v19  ;;  %v350_v27 = vpack.c.bf16 (!%p2761_p0), %v322_v25, %v321_v23  ;;  %v323_v31 = vld [vmem:[#allocation13 + $0x40] sm:$0xff] (!%p2761_p0)  ;;  %v340_v32 = vld [vmem:[#allocation13 + $0xc8] sm:$0xff] (!%p2761_p0)  ;;  %v341_v36 = vld [vmem:[#allocation13 + $0xd0] sm:$0xff] (!%p2761_p0)  ;;  %v400_v58 = vmul.f32 (!%p2761_p0), %v2179_v17, %v2179_v17  ;;  %v384_v59 = vmul.f32 (!%p2761_p0), %v320_v20, %v320_v20  ;;  %v401_v60 = vmul.f32 (!%p2761_p0), %v337_v21, %v337_v21 }
  0xa8   : > { %443 = vadd.xlane.f32.xlu1 (!%p2761_p0), %v395_v13  ;;  %413 = vadd.xlane.f32.xlu0 (!%p2761_p0), %v380_v14  ;;  %365 = vst [vmem:[#allocation5 + $0x10] sm:$0xff] (!%p2761_p0), %v349_v22  ;;  %v324_v33 = vld [vmem:[#allocation13 + $0x48] sm:$0xff] (!%p2761_p0)  ;;  %374 = vst [vmem:[#allocation5 + $0x58] sm:$0xff] (!%p2761_p0), %v358_v26  ;;  %v359_v34 = vpack.c.bf16 (!%p2761_p0), %v340_v32, %v339_v28  ;;  %v342_v37 = vld [vmem:[#allocation13 + $0xd8] sm:$0xff] (!%p2761_p0)  ;;  %v385_v61 = vmul.f32 (!%p2761_p0), %v321_v23, %v321_v23 }
  0xa9   : > { %366 = vst [vmem:[#allocation5 + $0x18] sm:$0xff] %v350_v27  ;;  %v351_v35 = vpack.c.bf16 %v324_v33, %v323_v31  ;;  %v325_v38 = vld [vmem:[#allocation13 + $0x50] sm:$0xff]  ;;  %v360_v39 = vpack.c.bf16 %v342_v37, %v341_v36  ;;  %v326_v40 = vld [vmem:[#allocation13 + $0x58] sm:$0xff]  ;;  %v343_v41 = vld [vmem:[#allocation13 + $0xe0] sm:$0xff]  ;;  %v402_v62 = vmul.f32 %v338_v24, %v338_v24  ;;  %v386_v63 = vmul.f32 %v322_v25, %v322_v25 }
  0xaa   : > { %375 = vst [vmem:[#allocation5 + $0x60] sm:$0xff] %v359_v34  ;;  %v352_v43 = vpack.c.bf16 %v326_v40, %v325_v38  ;;  %v327_v44 = vld [vmem:[#allocation13 + $0x60] sm:$0xff]  ;;  %v344_v45 = vld [vmem:[#allocation13 + $0xe8] sm:$0xff]  ;;  %v345_v50 = vld [vmem:[#allocation13 + $0xf0] sm:$0xff]  ;;  %v403_v0 = vmul.f32 %v339_v28, %v339_v28  ;;  %v387_v1 = vmul.f32 %v323_v31, %v323_v31  ;;  %v404_v2 = vmul.f32 %v340_v32, %v340_v32 }
  0xab   : > { %367 = vst [vmem:[#allocation5 + $0x20] sm:$0xff] %v351_v35  ;;  %v328_v46 = vld [vmem:[#allocation13 + $0x68] sm:$0xff]  ;;  %376 = vst [vmem:[#allocation5 + $0x68] sm:$0xff] %v360_v39  ;;  %v361_v48 = vpack.c.bf16 %v344_v45, %v343_v41  ;;  %v346_v51 = vld [vmem:[#allocation13 + $0xf8] sm:$0xff]  ;;  %v388_v3 = vmul.f32 %v324_v33, %v324_v33  ;;  %v405_v4 = vmul.f32 %v341_v36, %v341_v36  ;;  %v1893_v24 = vmov -1e+30  }
  0xac   : > { %445 = vadd.xlane.f32.xlu0 %v396_v29  ;;  %447 = vadd.xlane.f32.xlu1 %v397_v30  ;;  %v353_v49 = vpack.c.bf16 %v328_v46, %v327_v44  ;;  %368 = vst [vmem:[#allocation5 + $0x28] sm:$0xff] %v352_v43  ;;  %v329_v52 = vld [vmem:[#allocation13 + $0x70] sm:$0xff]  ;;  %v362_v53 = vpack.c.bf16 %v346_v51, %v345_v50  ;;  %v330_v54 = vld [vmem:[#allocation13 + $0x78] sm:$0xff]  ;;  %312 = vst.msk [vmem:[#allocation2] sm:$0xff] %vm311_vm0, %v1893_v24  ;;  %v1894_v25 = vmov 0.0  }
  0xad   : > { %377 = vst [vmem:[#allocation5 + $0x70] sm:$0xff] %v361_v48  ;;  %v354_v55 = vpack.c.bf16 %v330_v54, %v329_v52  ;;  %v389_v5 = vmul.f32 %v325_v38, %v325_v38  ;;  %v406_v6 = vmul.f32 %v342_v37, %v342_v37  ;;  %v390_v7 = vmul.f32 %v326_v40, %v326_v40 }
  0xae   : > { %369 = vst [vmem:[#allocation5 + $0x30] sm:$0xff] %v353_v49  ;;  %378 = vst [vmem:[#allocation5 + $0x78] sm:$0xff] %v362_v53  ;;  %v407_v8 = vmul.f32 %v343_v41, %v343_v41  ;;  %v391_v9 = vmul.f32 %v327_v44, %v327_v44  ;;  %v408_v10 = vmul.f32 %v344_v45, %v344_v45 }
  0xaf   : > { %370 = vst [vmem:[#allocation5 + $0x38] sm:$0xff] %v354_v55  ;;  %v392_v11 = vmul.f32 %v328_v46, %v328_v46  ;;  %v409_v12 = vmul.f32 %v345_v50, %v345_v50  ;;  %v393_v13 = vmul.f32 %v329_v52, %v329_v52  ;;  %v410_v14 = vmul.f32 %v346_v51, %v346_v51 }
  0xb0   : > { %449 = vadd.xlane.f32.xlu1 %v398_v47  ;;  %417 = vadd.xlane.f32.xlu0 %v382_v42  ;;  %v394_v15 = vmul.f32 %v330_v54, %v330_v54  ;;  %313 = vst.msk [vmem:[#allocation3] sm:$0xff] %vm311_vm0, %v1894_v25  ;;  %314 = vst [vmem:[#allocation4] sm:$0xff] %v1894_v25  ;;  %v1895_v50 = vmov 1966171168   ;;  %v545_v52 = vlaneseq }
  0xb1   : > { %v543_v51 = vunpack.c.l.s4 %v1895_v50 }
  0xb2   : > { %v546_v54 = vshrl.u32 %v545_v52, 7  ;;  %vm559_vm1 = vcmp.lt.s32.totalorder %v545_v52, 256 }
  0xb3   : > { %v544_v53 = vunpack.c.0.s8 %v543_v51 }
  0xb4   : > { %451 = vadd.xlane.f32.xlu1 %v399_v56  ;;  %419 = vadd.xlane.f32.xlu0 %v383_v57 }
  0xb5   : > { %v547_v56 = vsub.s32 %v544_v53, %v546_v54 }
  0xb8   : > { %453 = vadd.xlane.f32.xlu1 %v400_v58  ;;  %421 = vadd.xlane.f32.xlu0 %v384_v59 }
  0xbc   : > { %455 = vadd.xlane.f32.xlu1 %v401_v60  ;;  %423 = vadd.xlane.f32.xlu0 %v385_v61 }
  0xc0   : > { %457 = vadd.xlane.f32.xlu1 %v402_v62  ;;  %425 = vadd.xlane.f32.xlu0 %v386_v63 }
  0xc4   : > { %459 = vadd.xlane.f32.xlu1 %v403_v0  ;;  %427 = vadd.xlane.f32.xlu0 %v387_v1 }
  0xc8   : > { %461 = vadd.xlane.f32.xlu1 %v404_v2  ;;  %429 = vadd.xlane.f32.xlu0 %v388_v3 }
  0xcc   : > { %463 = vadd.xlane.f32.xlu1 %v405_v4  ;;  %431 = vadd.xlane.f32.xlu0 %v389_v5 }
  0xd0   : > { %465 = vadd.xlane.f32.xlu1 %v406_v6  ;;  %433 = vadd.xlane.f32.xlu0 %v390_v7 }
  0xd4   : > { %467 = vadd.xlane.f32.xlu1 %v407_v8  ;;  %435 = vadd.xlane.f32.xlu0 %v391_v9 }
  0xd8   : > { %469 = vadd.xlane.f32.xlu1 %v408_v10  ;;  %437 = vadd.xlane.f32.xlu0 %v392_v11 }
  0xdc   : > { %471 = vadd.xlane.f32.xlu1 %v409_v12  ;;  %439 = vadd.xlane.f32.xlu0 %v393_v13 }
  0xe0   : > { %473 = vadd.xlane.f32.xlu1 %v410_v14  ;;  %441 = vadd.xlane.f32.xlu0 %v394_v15 }
 0x131   : > { %v416_v16 = vpop.xlane.xlu1 %415  ;;  %v412_v17 = vpop.xlane.xlu0 %411 }
 0x132   : > { %475 = vxpose.xlu0.b32.start [1/16] (narrow) %v412_v17, 8 }
 0x135   : > { %v444_v18 = vpop.xlane.xlu1 %443  ;;  %v414_v19 = vpop.xlane.xlu0 %413 }
 0x136   : > { %507 = vxpose.xlu1.b32.start [1/16] (narrow) %v444_v18, 8  ;;  %476 = vxpose.xlu0.b32.cont [2/16] (narrow) %v414_v19, 8 }
 0x139   : > { %v446_v20 = vpop.xlane.xlu0 %445  ;;  %v448_v21 = vpop.xlane.xlu1 %447 }
 0x13a   : > { %477 = vxpose.xlu0.b32.cont [3/16] (narrow) %v416_v16, 8  ;;  %508 = vxpose.xlu1.b32.cont [2/16] (narrow) %v446_v20, 8 }
 0x13d   : > { %v450_v22 = vpop.xlane.xlu1 %449  ;;  %v418_v23 = vpop.xlane.xlu0 %417 }
 0x13e   : > { %509 = vxpose.xlu1.b32.cont [3/16] (narrow) %v448_v21, 8  ;;  %478 = vxpose.xlu0.b32.cont [4/16] (narrow) %v418_v23, 8 }
 0x141   : > { %v452_v26 = vpop.xlane.xlu1 %451  ;;  %v420_v27 = vpop.xlane.xlu0 %419 }
 0x142   : > { %510 = vxpose.xlu1.b32.cont [4/16] (narrow) %v450_v22, 8  ;;  %479 = vxpose.xlu0.b32.cont [5/16] (narrow) %v420_v27, 8 }
 0x145   : > { %v454_v28 = vpop.xlane.xlu1 %453  ;;  %v422_v29 = vpop.xlane.xlu0 %421 }
 0x146   : > { %511 = vxpose.xlu1.b32.cont [5/16] (narrow) %v452_v26, 8  ;;  %480 = vxpose.xlu0.b32.cont [6/16] (narrow) %v422_v29, 8 }
 0x149   : > { %v456_v30 = vpop.xlane.xlu1 %455  ;;  %v424_v31 = vpop.xlane.xlu0 %423 }
 0x14a   : > { %512 = vxpose.xlu1.b32.cont [6/16] (narrow) %v454_v28, 8  ;;  %481 = vxpose.xlu0.b32.cont [7/16] (narrow) %v424_v31, 8 }
 0x14d   : > { %v458_v32 = vpop.xlane.xlu1 %457  ;;  %v426_v33 = vpop.xlane.xlu0 %425 }
 0x14e   : > { %513 = vxpose.xlu1.b32.cont [7/16] (narrow) %v456_v30, 8  ;;  %482 = vxpose.xlu0.b32.cont [8/16] (narrow) %v426_v33, 8 }
 0x151   : > { %v460_v34 = vpop.xlane.xlu1 %459  ;;  %v428_v35 = vpop.xlane.xlu0 %427 }
 0x152   : > { %514 = vxpose.xlu1.b32.cont [8/16] (narrow) %v458_v32, 8  ;;  %483 = vxpose.xlu0.b32.cont [9/16] (narrow) %v428_v35, 8 }
 0x155   : > { %v462_v36 = vpop.xlane.xlu1 %461  ;;  %v430_v37 = vpop.xlane.xlu0 %429 }
 0x156   : > { %515 = vxpose.xlu1.b32.cont [9/16] (narrow) %v460_v34, 8  ;;  %484 = vxpose.xlu0.b32.cont [10/16] (narrow) %v430_v37, 8 }
 0x159   : > { %v464_v38 = vpop.xlane.xlu1 %463  ;;  %v432_v39 = vpop.xlane.xlu0 %431 }
 0x15a   : > { %516 = vxpose.xlu1.b32.cont [10/16] (narrow) %v462_v36, 8  ;;  %485 = vxpose.xlu0.b32.cont [11/16] (narrow) %v432_v39, 8 }
 0x15d   : > { %v466_v40 = vpop.xlane.xlu1 %465  ;;  %v434_v41 = vpop.xlane.xlu0 %433 }
 0x15e   : > { %517 = vxpose.xlu1.b32.cont [11/16] (narrow) %v464_v38, 8  ;;  %486 = vxpose.xlu0.b32.cont [12/16] (narrow) %v434_v41, 8 }
 0x161   : > { %v468_v42 = vpop.xlane.xlu1 %467  ;;  %v436_v43 = vpop.xlane.xlu0 %435 }
 0x162   : > { %518 = vxpose.xlu1.b32.cont [12/16] (narrow) %v466_v40, 8  ;;  %487 = vxpose.xlu0.b32.cont [13/16] (narrow) %v436_v43, 8 }
 0x165   : > { %v470_v44 = vpop.xlane.xlu1 %469  ;;  %v438_v45 = vpop.xlane.xlu0 %437 }
 0x166   : > { %519 = vxpose.xlu1.b32.cont [13/16] (narrow) %v468_v42, 8  ;;  %488 = vxpose.xlu0.b32.cont [14/16] (narrow) %v438_v45, 8 }
 0x169   : > { %v472_v46 = vpop.xlane.xlu1 %471  ;;  %v440_v47 = vpop.xlane.xlu0 %439 }
 0x16a   : > { %520 = vxpose.xlu1.b32.cont [14/16] (narrow) %v470_v44, 8  ;;  %489 = vxpose.xlu0.b32.cont [15/16] (narrow) %v440_v47, 8 }
 0x16d   : > { %v442_v48 = vpop.xlane.xlu0 %441  ;;  %v474_v49 = vpop.xlane.xlu1 %473 }
 0x16e   : > { %521 = vxpose.xlu1.b32.cont [15/16] (narrow) %v472_v46, 8  ;;  %490 = vxpose.xlu0.b32.end [16/16] (narrow) %v442_v48, 8 }
 0x172   : > { %522 = vxpose.xlu1.b32.end [16/16] (narrow) %v474_v49, 8 }
 0x1b2   : > { %v491_v55 = vpop.trf.xlu0 }
 0x1b6   : > { %v523_v57 = vpop.trf.xlu1 }
 0x1b7   : > { %v541_v58 = vcombine.low %v491_v55, %v523_v57 }
 0x1b9   : > { %v548_v59 = vrot.slane %v541_v58, %v547_v56 }
 0x1bb   : > { %v555_v60 = vrot.slane %v548_v59, %v547_v56 }
 0x1bd   : > { %561 = vst.msk [vmem:[#allocation6] sm:$0x3] %vm559_vm1, %v555_v60 }
 0x1be PF: > { %v564_v0 = vld [vmem:[%s2171_s12] sm:$0xff]  ;;  %v565_v1 = vld [vmem:[%s2171_s12 + $0x8] sm:$0xff]  ;;  %v2189_v3 = vld [vmem:[%s2171_s12 + $0x10] sm:$0xff]  ;;  %v1896_v58 = vmov 0   ;;  %v767_v59 = vlaneseq  ;;  %p1428_p2 = scmp.ne.s32.totalorder %s1950_s22, 1 }
 0x1bf   : > { %v2186_v2 = vpack.c.bf16 %v565_v1, %v564_v0  ;;  %v604_v4 = vmul.f32 %v564_v0, %v564_v0  ;;  %v2192_v7 = vld [vmem:[%s2171_s12 + $0x18] sm:$0xff]  ;;  %v606_v8 = vmul.f32 %v2189_v3, %v2189_v3  ;;  %v572_v9 = vld [vmem:[%s2171_s12 + $0x40] sm:$0xff]  ;;  %v573_v10 = vld [vmem:[%s2171_s12 + $0x48] sm:$0xff]  ;;  %v605_v12 = vmul.f32 %v565_v1, %v565_v1  ;;  %1586 = vset.pattern.permute.xlu0 %v1896_v58 }
 0x1c0   : > { %v589_v5 = vld [vmem:[#allocation5 + $0x8] sm:$0xff]  ;;  %v574_v11 = vld [vmem:[%s2171_s12 + $0x50] sm:$0xff]  ;;  %v2200_v13 = vpack.c.bf16 %v573_v10, %v572_v9  ;;  %v577_v16 = vld [vmem:[%s2171_s12 + $0x68] sm:$0xff]  ;;  %v607_v17 = vmul.f32 %v2192_v7, %v2192_v7  ;;  %v612_v33 = vmul.f32 %v572_v9, %v572_v9  ;;  %v613_v34 = vmul.f32 %v573_v10, %v573_v10  ;;  %1587 = vset.pattern.permute.xlu1 %v1896_v58 }
 0x1c1   : > { %v588_v62 = vld [vmem:[#allocation5] sm:$0xff]  ;;  %1450 = vmatprep.mubr.bf16.mxu0 %v2186_v2  ;;  %620 = vadd.xlane.f32.xlu0 %v604_v4  ;;  %v576_v15 = vld [vmem:[%s2171_s12 + $0x60] sm:$0xff]  ;;  %v569_v24 = vld [vmem:[%s2171_s12 + $0x28] sm:$0xff]  ;;  %v614_v37 = vmul.f32 %v574_v11, %v574_v11  ;;  %v617_v40 = vmul.f32 %v577_v16, %v577_v16  ;;  %v2221_v50 = vpack.c.bf16 %v2192_v7, %v2189_v3 }
 0x1c2   : > { %v596_v61 = vld [vmem:[#allocation5 + $0x40] sm:$0xff]  ;;  %v597_v63 = vld [vmem:[#allocation5 + $0x48] sm:$0xff]  ;;  %624 = vadd.xlane.f32.xlu1 %v606_v8  ;;  %v2209_v19 = vpack.c.bf16 %v577_v16, %v576_v15  ;;  %v609_v26 = vmul.f32 %v569_v24, %v569_v24  ;;  %v616_v39 = vmul.f32 %v576_v15, %v576_v15  ;;  %v602_v46 = vld [vmem:[#allocation5 + $0x70] sm:$0xff] }
 0x1c3   : > { %1434 = vmatprep.subr.bf16.mxu0 %v596_v61  ;;  %v598_v6 = vld [vmem:[#allocation5 + $0x50] sm:$0xff]  ;;  %v575_v14 = vld [vmem:[%s2171_s12 + $0x58] sm:$0xff]  ;;  %v578_v20 = vld [vmem:[%s2171_s12 + $0x70] sm:$0xff] }
 0x1c4   : > { %1435 = vmatpush3.bf16.xpose.msra.mxu0 %v588_v62  ;;  %v2207_v18 = vpack.c.bf16 %v575_v14, %v574_v11  ;;  %v579_v21 = vld [vmem:[%s2171_s12 + $0x78] sm:$0xff]  ;;  %v568_v22 = vld [vmem:[%s2171_s12 + $0x20] sm:$0xff]  ;;  %v570_v28 = vld [vmem:[%s2171_s12 + $0x30] sm:$0xff]  ;;  %v615_v38 = vmul.f32 %v575_v14, %v575_v14  ;;  %v618_v43 = vmul.f32 %v578_v20, %v578_v20  ;;  %v768_v62 = vshrl.u32 %v767_v59, 7 }
 0x1c5   : > { %1436 = vmatprep.subr.bf16.mxu0 %v597_v63  ;;  %v2214_v23 = vpack.c.bf16 %v579_v21, %v578_v20  ;;  %622 = vadd.xlane.f32.xlu0 %v605_v12  ;;  %v608_v25 = vmul.f32 %v568_v22, %v568_v22  ;;  %v590_v27 = vld [vmem:[#allocation5 + $0x10] sm:$0xff]  ;;  %v599_v29 = vld [vmem:[#allocation5 + $0x58] sm:$0xff]  ;;  %v571_v30 = vld [vmem:[%s2171_s12 + $0x38] sm:$0xff]  ;;  %v610_v31 = vmul.f32 %v570_v28, %v570_v28 }
 0x1c6   : > { %626 = vadd.xlane.f32.xlu1 %v607_v17  ;;  %v611_v32 = vmul.f32 %v571_v30, %v571_v30  ;;  %v591_v35 = vld [vmem:[#allocation5 + $0x18] sm:$0xff]  ;;  %v600_v36 = vld [vmem:[#allocation5 + $0x60] sm:$0xff]  ;;  %v601_v42 = vld [vmem:[#allocation5 + $0x68] sm:$0xff]  ;;  %v619_v44 = vmul.f32 %v579_v21, %v579_v21  ;;  %v2225_v51 = vpack.c.bf16 %v569_v24, %v568_v22  ;;  %v2229_v52 = vpack.c.bf16 %v571_v30, %v570_v28 }
 0x1c7   : > { %v592_v41 = vld [vmem:[#allocation5 + $0x20] sm:$0xff]  ;;  %v593_v45 = vld [vmem:[#allocation5 + $0x28] sm:$0xff]  ;;  %v594_v47 = vld [vmem:[#allocation5 + $0x30] sm:$0xff]  ;;  %v769_v1 = vsub.s32 0, %v768_v62  ;;  %v773_v3 = vsub.s32 1, %v768_v62 }
 0x1c8   : > { %v603_v48 = vld [vmem:[#allocation5 + $0x78] sm:$0xff]  ;;  %v1130_v53 = vld [vmem:[#allocation7 + $0x8] sm:$0xff]  ;;  %v563_v56 = vld [vmem:[#allocation12] sm:$0xff] }
 0x1c9   : > { %628 = vadd.xlane.f32.xlu0 %v608_v25  ;;  %v595_v49 = vld [vmem:[#allocation5 + $0x38] sm:$0xff]  ;;  %v1132_v54 = vpack.c.bf16 %v1130_v53, %v1130_v53 }
 0x1ca   : > { %630 = vadd.xlane.f32.xlu1 %v609_v26 }
 0x1cb   : > { %1181 = vmatprep.mubr.bf16.mxu1 %v1132_v54 }
 0x1cc   : > { %1437 = vmatpush3.bf16.xpose.msra.mxu0 %v589_v5  ;;  %v765_v5 = vld [vmem:[#allocation6] sm:$0x3] }
 0x1cd   : > { %1438 = vmatprep.subr.bf16.mxu0 %v598_v6  ;;  %632 = vadd.xlane.f32.xlu0 %v610_v31  ;;  %v2242_v7 = vrot.slane %v765_v5, %v769_v1  ;;  %v2244_v8 = vrot.slane %v765_v5, %v773_v3 }
 0x1ce   : > { %634 = vadd.xlane.f32.xlu1 %v611_v32 }
 0x1d1   : > { %636 = vadd.xlane.f32.xlu0 %v612_v33 }
 0x1d2   : > { %638 = vadd.xlane.f32.xlu1 %v613_v34 }
 0x1d4   : > { %1439 = vmatpush3.bf16.xpose.msra.mxu0 %v590_v27 }
 0x1d5   : > { %1440 = vmatprep.subr.bf16.mxu0 %v599_v29  ;;  %640 = vadd.xlane.f32.xlu0 %v614_v37 }
 0x1d6   : > { %642 = vadd.xlane.f32.xlu1 %v615_v38 }
 0x1d9   : > { %644 = vadd.xlane.f32.xlu0 %v616_v39 }
 0x1da   : > { %646 = vadd.xlane.f32.xlu1 %v617_v40 }
 0x1dc   : > { %1441 = vmatpush3.bf16.xpose.msra.mxu0 %v591_v35 }
 0x1dd   : > { %1442 = vmatprep.subr.bf16.mxu0 %v600_v36  ;;  %648 = vadd.xlane.f32.xlu0 %v618_v43 }
 0x1de   : > { %650 = vadd.xlane.f32.xlu1 %v619_v44 }
 0x1e4   : > { %1443 = vmatpush3.bf16.xpose.msra.mxu0 %v592_v41 }
 0x1e5   : > { %1444 = vmatprep.subr.bf16.mxu0 %v601_v42 }
 0x1ec   : > { %1445 = vmatpush3.bf16.xpose.msra.mxu0 %v593_v45 }
 0x1ed   : > { %1446 = vmatprep.subr.bf16.mxu0 %v602_v46 }
 0x1f3   : > { %1191 = vperm.xlu0 %1586, %v563_v56  }
 0x1f4   : > { %1447 = vmatpush3.bf16.xpose.msra.mxu0 %v594_v47 }
 0x1f5   : > { %1448 = vmatprep.subr.bf16.mxu0 %v603_v48 }
 0x1fc   : > { %1449 = vmatpush3.bf16.xpose.msra.mxu0 %v595_v49 }
 0x203   : > { %1451 = vmatmul.mubr.bf16.vlgmr.msra.gmra.mrb[0].mxu0 %v2186_v2 }
 0x204   : > { %1452 = vmatprep.mubr.bf16.mxu0 %v2221_v50 }
 0x20b   : > { %1453 = vmatmul.mubr.bf16.gmra.mrb[4].mxu0 %v2221_v50 }
 0x20c   : > { %1454 = vmatprep.mubr.bf16.mxu0 %v2225_v51 }
 0x213   : > { %1455 = vmatmul.mubr.bf16.gmra.mrb[8].mxu0 %v2225_v51 }
 0x214   : > { %1456 = vmatprep.mubr.bf16.mxu0 %v2229_v52 }
 0x21b   : > { %1457 = vmatmul.mubr.bf16.gmra.mrb[12].mxu0 %v2229_v52 }
 0x21c   : > { %1458 = vmatprep.mubr.bf16.mxu0 %v2200_v13 }
 0x223   : > { %1459 = vmatmul.mubr.bf16.gmra.mrb[16].mxu0 %v2200_v13 }
 0x224   : > { %1460 = vmatprep.mubr.bf16.mxu0 %v2207_v18 }
 0x22b   : > { %1461 = vmatmul.mubr.bf16.gmra.mrb[20].mxu0 %v2207_v18 }
 0x22c   : > { %1462 = vmatprep.mubr.bf16.mxu0 %v2209_v19 }
 0x233   : > { %1463 = vmatmul.mubr.bf16.gmra.mrb[24].mxu0 %v2209_v19 }
 0x234   : > { %1464 = vmatprep.mubr.bf16.mxu0 %v2214_v23 }
 0x23b   : > { %1465 = vmatmul.mubr.bf16.gmra.mrb[28].mxu0 %v2214_v23 }
 0x24e   : > { %v621_v55 = vpop.xlane.xlu0 %620 }
 0x24f   : > { %v625_v57 = vpop.xlane.xlu1 %624  ;;  %v777_v11 = vadd.f32 %v2242_v7, %v621_v55  ;;  %v778_v12 = vadd.f32 %v2244_v8, %v621_v55 }
 0x250   : > { %v2251_v20 = vadd.f32 %v2242_v7, %v625_v57  ;;  %v2254_v21 = vadd.f32 %v2244_v8, %v625_v57 }
 0x252   : > { %v623_v60 = vpop.xlane.xlu0 %622 }
 0x253   : > { %v627_v61 = vpop.xlane.xlu1 %626  ;;  %v779_v14 = vadd.f32 %v2242_v7, %v623_v60  ;;  %v780_v17 = vadd.f32 %v2244_v8, %v623_v60 }
 0x254   : > { %v2257_v22 = vadd.f32 %v2242_v7, %v627_v61  ;;  %v2260_v27 = vadd.f32 %v2244_v8, %v627_v61 }
 0x256   : > { %v629_v63 = vpop.xlane.xlu0 %628 }
 0x257   : > { %v631_v0 = vpop.xlane.xlu1 %630  ;;  %v2263_v28 = vadd.f32 %v2242_v7, %v629_v63  ;;  %v2266_v29 = vadd.f32 %v2244_v8, %v629_v63 }
 0x258   : > { %v2269_v32 = vadd.f32 %v2242_v7, %v631_v0  ;;  %v2272_v33 = vadd.f32 %v2244_v8, %v631_v0 }
 0x25a   : > { %v633_v4 = vpop.xlane.xlu0 %632 }
 0x25b   : > { %v635_v6 = vpop.xlane.xlu1 %634  ;;  %v2275_v34 = vadd.f32 %v2242_v7, %v633_v4  ;;  %v2278_v38 = vadd.f32 %v2244_v8, %v633_v4 }
 0x25c   : > { %v2281_v39 = vadd.f32 %v2242_v7, %v635_v6  ;;  %v2284_v43 = vadd.f32 %v2244_v8, %v635_v6 }
 0x25e   : > { %v637_v9 = vpop.xlane.xlu0 %636 }
 0x25f   : > { %v639_v10 = vpop.xlane.xlu1 %638  ;;  %v2287_v44 = vadd.f32 %v2242_v7, %v637_v9  ;;  %v2292_v48 = vadd.f32 %v2244_v8, %v637_v9 }
 0x260   : > { %v2295_v49 = vadd.f32 %v2242_v7, %v639_v10  ;;  %v2300_v55 = vadd.f32 %v2244_v8, %v639_v10 }
 0x262   : > { %v641_v15 = vpop.xlane.xlu0 %640 }
 0x263   : > { %v643_v24 = vpop.xlane.xlu1 %642  ;;  %v2303_v56 = vadd.f32 %v2242_v7, %v641_v15  ;;  %v2309_v58 = vadd.f32 %v2244_v8, %v641_v15 }
 0x264   : > { %v2312_v59 = vadd.f32 %v2242_v7, %v643_v24  ;;  %v2318_v63 = vadd.f32 %v2244_v8, %v643_v24 }
 0x266   : > { %v645_v40 = vpop.xlane.xlu0 %644 }
 0x267   : > { %v647_v45 = vpop.xlane.xlu1 %646  ;;  %v2321_v0 = vadd.f32 %v2242_v7, %v645_v40  ;;  %v2325_v5 = vadd.f32 %v2244_v8, %v645_v40 }
 0x268   : > { %v2328_v6 = vadd.f32 %v2242_v7, %v647_v45 }
 0x26a   : > { %v649_v60 = vpop.xlane.xlu0 %648 }
 0x26b   : > { %v651_v1 = vpop.xlane.xlu1 %650 }
 0x26c   : > { %v2342_v24 = vadd.f32 %v2242_v7, %v651_v1 }
 0x2d6   : > { %v686_v16 = vpop.f32.mrb[0].mxu0 }
 0x2d7   : > { %v809_v25 = vmul.f32 2.0, %v686_v16  ;;  %v688_v26 = vpop.f32.mrb[1].mxu0 }
 0x2d8   : > { %v810_v30 = vmul.f32 2.0, %v688_v26  ;;  %v690_v31 = vpop.f32.mrb[2].mxu0 }
 0x2d9   : > { %v841_v35 = vsub.f32 %v777_v11, %v809_v25  ;;  %v811_v36 = vmul.f32 2.0, %v690_v31  ;;  %v692_v37 = vpop.f32.mrb[3].mxu0  ;;  %v2332_v11 = vadd.f32 %v2244_v8, %v647_v45 }
 0x2da   : > { %v842_v41 = vsub.f32 %v778_v12, %v810_v30  ;;  %v812_v42 = vmul.f32 2.0, %v692_v37  ;;  %v2335_v12 = vadd.f32 %v2242_v7, %v649_v60  ;;  %v2347_v30 = vadd.f32 %v2244_v8, %v651_v1 }
 0x2db   : > { %v2289_v46 = vmax.f32 %v841_v35, 0.0  ;;  %v843_v47 = vsub.f32 %v779_v14, %v811_v36 }
 0x2dc   : > { %v2297_v53 = vmax.f32 %v842_v41, 0.0  ;;  %v844_v54 = vsub.f32 %v780_v17, %v812_v42  ;;  %v2339_v17 = vadd.f32 %v2244_v8, %v649_v60 }
 0x2dd   : > { %v2305_v57 = vmax.f32 %v843_v47, 0.0  ;;  %1588 = vrsqrt.f32 %v2289_v46  ;;  %vm907_vm2 = vcmp.eq.f32.partialorder %v2289_v46, inf  ;;  %vm909_vm5 = vcmp.eq.f32.partialorder %v2289_v46, 0.0 }
 0x2de   : > { %v2314_v61 = vmax.f32 %v844_v54, 0.0  ;;  %v696_v62 = vpop.f32.mrb[4].mxu0  ;;  %1590 = vrsqrt.f32 %v2297_v53  ;;  %vm914_vm3 = vcmp.eq.f32.partialorder %v2297_v53, inf  ;;  %vm916_vm4 = vcmp.eq.f32.partialorder %v2297_v53, 0.0 }
 0x2df   : > { %v813_v3 = vmul.f32 2.0, %v696_v62  ;;  %v698_v4 = vpop.f32.mrb[5].mxu0  ;;  %1592 = vrsqrt.f32 %v2305_v57  ;;  %v910_v36 = vand.u32 2147483648, %v2289_v46  ;;  %vm921_vm8 = vcmp.eq.f32.partialorder %v2305_v57, inf }
 0x2e0   : > { %v814_v9 = vmul.f32 2.0, %v698_v4  ;;  %v700_v10 = vpop.f32.mrb[6].mxu0  ;;  %1594 = vrsqrt.f32 %v2314_v61  ;;  %vm928_vm6 = vcmp.eq.f32.partialorder %v2314_v61, inf  ;;  %vm930_vm7 = vcmp.eq.f32.partialorder %v2314_v61, 0.0 }
 0x2e1   : > { %v845_v14 = vsub.f32 %v2251_v20, %v813_v3  ;;  %v815_v15 = vmul.f32 2.0, %v700_v10  ;;  %v702_v16 = vpop.f32.mrb[7].mxu0  ;;  %vm923_vm9 = vcmp.eq.f32.partialorder %v2305_v57, 0.0  ;;  %v924_v45 = vand.u32 2147483648, %v2305_v57 }
 0x2e2   : > { %v846_v25 = vsub.f32 %v2254_v21, %v814_v9  ;;  %v816_v26 = vmul.f32 2.0, %v702_v16  ;;  %v917_v21 = vand.u32 2147483648, %v2297_v53 }
 0x2e3   : > { %v2349_v31 = vmax.f32 %v845_v14, 0.0  ;;  %v847_v20 = vsub.f32 %v2257_v22, %v815_v15 }
 0x2e4   : > { %v2354_v35 = vmax.f32 %v846_v25, 0.0  ;;  %v848_v7 = vsub.f32 %v2260_v27, %v816_v26  ;;  %v931_v27 = vand.u32 2147483648, %v2314_v61 }
 0x2e5   : > { %1596 = vrsqrt.f32 %v2349_v31  ;;  %v2361_v8 = vmax.f32 %v847_v20, 0.0  ;;  %v938_v15 = vand.u32 2147483648, %v2349_v31  ;;  %vm935_vm11 = vcmp.eq.f32.partialorder %v2349_v31, inf }
 0x2e6   : > { %1598 = vrsqrt.f32 %v2354_v35  ;;  %v2366_v22 = vmax.f32 %v848_v7, 0.0  ;;  %v706_v37 = vpop.f32.mrb[8].mxu0  ;;  %v945_v1 = vand.u32 2147483648, %v2354_v35  ;;  %vm942_vm10 = vcmp.eq.f32.partialorder %v2354_v35, inf }
 0x2e7   : > { %v1589_v40 = vpop.eup %1588  ;;  %1600 = vrsqrt.f32 %v2361_v8  ;;  %v817_v41 = vmul.f32 2.0, %v706_v37  ;;  %v708_v42 = vpop.f32.mrb[9].mxu0  ;;  %vm944_vm12 = vcmp.eq.f32.partialorder %v2354_v35, 0.0  ;;  %vm937_vm14 = vcmp.eq.f32.partialorder %v2349_v31, 0.0 }
 0x2e8   : > { %v1591_v47 = vpop.eup %1590  ;;  %1602 = vrsqrt.f32 %v2366_v22  ;;  %v818_v54 = vmul.f32 2.0, %v708_v42  ;;  %v710_v60 = vpop.f32.mrb[10].mxu0  ;;  %v906_v62 = vmul.f32 %v1589_v40, %v2289_v46  ;;  %vm956_vm13 = vcmp.eq.f32.partialorder %v2366_v22, inf }
 0x2e9   : > { %v1593_v3 = vpop.eup %1592  ;;  %v849_v4 = vsub.f32 %v2263_v28, %v817_v41  ;;  %v819_v9 = vmul.f32 2.0, %v710_v60  ;;  %v712_v10 = vpop.f32.mrb[11].mxu0  ;;  %v913_v14 = vmul.f32 %v1591_v47, %v2297_v53  ;;  %vm958_vm15 = vcmp.eq.f32.partialorder %v2366_v22, 0.0 }
 0x2ea   : > { %v1595_v16 = vpop.eup %1594  ;;  %v850_v25 = vsub.f32 %v2266_v29, %v818_v54  ;;  %v820_v26 = vmul.f32 2.0, %v712_v10  ;;  %v908_v20 = vsel %vm907_vm2, %v2289_v46, %v906_v62  ;;  %v920_v7 = vmul.f32 %v1593_v3, %v2305_v57 }
 0x2eb   : > { %v2385_v37 = vmax.f32 %v849_v4, 0.0  ;;  %v851_v28 = vsub.f32 %v2269_v32, %v819_v9  ;;  %v915_v40 = vsel %vm914_vm3, %v2297_v53, %v913_v14  ;;  %v927_v41 = vmul.f32 %v1595_v16, %v2314_v61 }
 0x2ec   : > { %v2393_v29 = vmax.f32 %v850_v25, 0.0  ;;  %v852_v42 = vsub.f32 %v2272_v33, %v820_v26  ;;  %v918_v47 = vsel %vm916_vm4, %v917_v21, %v915_v40  ;;  %v911_v60 = vsel %vm909_vm5, %v910_v36, %v908_v20 }
 0x2ed   : > { %v2400_v32 = vmax.f32 %v851_v28, 0.0  ;;  %v929_v54 = vsel %vm928_vm6, %v2314_v61, %v927_v41  ;;  %v922_v33 = vsel %vm921_vm8, %v2305_v57, %v920_v7  ;;  %v959_v41 = vand.u32 2147483648, %v2366_v22 }
 0x2ee   : > { %1604 = vrsqrt.f32 %v2393_v29  ;;  %v2411_v53 = vmax.f32 %v852_v42, 0.0  ;;  %v716_v21 = vpop.f32.mrb[12].mxu0  ;;  %v932_v62 = vsel %vm930_vm7, %v931_v27, %v929_v54  ;;  %v925_v3 = vsel %vm923_vm9, %v924_v45, %v922_v33 }
 0x2ef   : > { %v1597_v4 = vpop.eup %1596  ;;  %1606 = vrsqrt.f32 %v2385_v37  ;;  %v821_v46 = vmul.f32 2.0, %v716_v21  ;;  %v718_v36 = vpop.f32.mrb[13].mxu0  ;;  %v1134_v9 = vpack.c.bf16 %v932_v62, %v918_v47  ;;  %v1133_v10 = vpack.c.bf16 %v925_v3, %v911_v60 }
 0x2f0   : > { %v1599_v14 = vpop.eup %1598  ;;  %1608 = vrsqrt.f32 %v2411_v53  ;;  %v822_v16 = vmul.f32 2.0, %v718_v36  ;;  %v720_v25 = vpop.f32.mrb[14].mxu0  ;;  %v934_v61 = vmul.f32 %v1597_v4, %v2349_v31  ;;  %vm949_vm0 = vcmp.eq.f32.partialorder %v2361_v8, inf }
 0x2f1   : > { %v1601_v57 = vpop.eup %1600  ;;  %1610 = vrsqrt.f32 %v2400_v32  ;;  %v853_v27 = vsub.f32 %v2275_v34, %v821_v46  ;;  %v823_v45 = vmul.f32 2.0, %v720_v25  ;;  %v722_v26 = vpop.f32.mrb[15].mxu0  ;;  %1149 = vmatprep.subr.bf16.mxu1 %v1134_v9  ;;  %v941_v20 = vmul.f32 %v1599_v14, %v2354_v35 }
 0x2f2   : > { %v1603_v7 = vpop.eup %1602  ;;  %v854_v28 = vsub.f32 %v2278_v38, %v822_v16  ;;  %v824_v40 = vmul.f32 2.0, %v722_v26  ;;  %1150 = vmatpush1.bf16.xpose.msra.mxu1 %v1133_v10  ;;  %v948_v42 = vmul.f32 %v1601_v57, %v2361_v8  ;;  %v936_v21 = vsel %vm935_vm11, %v2349_v31, %v934_v61 }
 0x2f3   : > { %v2428_v47 = vmax.f32 %v853_v27, 0.0  ;;  %v855_v54 = vsub.f32 %v2281_v39, %v823_v45  ;;  %v943_v34 = vsel %vm942_vm10, %v2354_v35, %v941_v20  ;;  %v955_v60 = vmul.f32 %v1603_v7, %v2366_v22 }
 0x2f4   : > { %v2435_v33 = vmax.f32 %v854_v28, 0.0  ;;  %v856_v38 = vsub.f32 %v2284_v43, %v824_v40  ;;  %v946_v39 = vsel %vm944_vm12, %v945_v1, %v943_v34  ;;  %v950_v36 = vsel %vm949_vm0, %v2361_v8, %v948_v42 }
 0x2f5   : > { %1612 = vrsqrt.f32 %v2428_v47  ;;  %v2443_v62 = vmax.f32 %v855_v54, 0.0  ;;  %v957_v3 = vsel %vm956_vm13, %v2366_v22, %v955_v60  ;;  %v952_v1 = vand.u32 2147483648, %v2361_v8 }
 0x2f6   : > { %1614 = vrsqrt.f32 %v2435_v33  ;;  %v2453_v43 = vmax.f32 %v856_v38, 0.0  ;;  %v726_v4 = vpop.f32.mrb[16].mxu0  ;;  %v960_v46 = vsel %vm958_vm15, %v959_v41, %v957_v3  ;;  %v939_v22 = vsel %vm937_vm14, %v938_v15, %v936_v21 }
 0x2f7   : > { %1616 = vrsqrt.f32 %v2443_v62  ;;  %v825_v9 = vmul.f32 2.0, %v726_v4  ;;  %v728_v10 = vpop.f32.mrb[17].mxu0  ;;  %v1136_v35 = vpack.c.bf16 %v960_v46, %v946_v39  ;;  %vm951_vm1 = vcmp.eq.f32.partialorder %v2361_v8, 0.0 }
 0x2f8   : > { %v1605_v14 = vpop.eup %1604  ;;  %1618 = vrsqrt.f32 %v2453_v43  ;;  %v826_v16 = vmul.f32 2.0, %v728_v10  ;;  %v730_v25 = vpop.f32.mrb[18].mxu0  ;;  %v953_v26 = vsel %vm951_vm1, %v952_v1, %v950_v36  ;;  %vm970_vm2 = vcmp.eq.f32.partialorder %v2393_v29, inf }
 0x2f9   : > { %v1607_v61 = vpop.eup %1606  ;;  %v857_v57 = vsub.f32 %v2287_v44, %v825_v9  ;;  %v827_v27 = vmul.f32 2.0, %v730_v25  ;;  %v732_v45 = vpop.f32.mrb[19].mxu0  ;;  %1151 = vmatprep.subr.bf16.mxu1 %v1136_v35  ;;  %v969_v20 = vmul.f32 %v1605_v14, %v2393_v29  ;;  %v1135_v41 = vpack.c.bf16 %v953_v26, %v939_v22 }
 0x2fa   : > { %v1609_v7 = vpop.eup %1608  ;;  %v858_v28 = vsub.f32 %v2292_v48, %v826_v16  ;;  %v828_v40 = vmul.f32 2.0, %v732_v45  ;;  %vm972_vm3 = vcmp.eq.f32.partialorder %v2393_v29, 0.0  ;;  %vm984_vm4 = vcmp.eq.f32.partialorder %v2411_v53, inf }
 0x2fb   : > { %v1611_v31 = vpop.eup %1610  ;;  %v2470_v15 = vmax.f32 %v857_v57, 0.0  ;;  %v859_v8 = vsub.f32 %v2295_v49, %v827_v27  ;;  %v983_v44 = vmul.f32 %v1609_v7, %v2411_v53  ;;  %1152 = vmatpush1.bf16.xpose.msra.mxu1 %v1135_v41  ;;  %v971_v48 = vsel %vm970_vm2, %v2393_v29, %v969_v20 }
 0x2fc   : > { %v2475_v42 = vmax.f32 %v858_v28, 0.0  ;;  %v860_v54 = vsub.f32 %v2300_v55, %v828_v40  ;;  %v973_v60 = vand.u32 2147483648, %v2393_v29  ;;  %v987_v55 = vand.u32 2147483648, %v2411_v53 }
 0x2fd   : > { %1620 = vrsqrt.f32 %v2470_v15  ;;  %v2481_v34 = vmax.f32 %v859_v8, 0.0  ;;  %v985_v49 = vsel %vm984_vm4, %v2411_v53, %v983_v44  ;;  %v962_v39 = vmul.f32 %v1607_v61, %v2385_v37 }
 0x2fe   : > { %1622 = vrsqrt.f32 %v2475_v42  ;;  %v2486_v38 = vmax.f32 %v860_v54, 0.0  ;;  %v736_v21 = vpop.f32.mrb[20].mxu0  ;;  %v974_v36 = vsel %vm972_vm3, %v973_v60, %v971_v48  ;;  %vm986_vm5 = vcmp.eq.f32.partialorder %v2411_v53, 0.0 }
 0x2ff   : > { %v2490_v3 = vpop.eup %1612  ;;  %1624 = vrsqrt.f32 %v2481_v34  ;;  %v829_v4 = vmul.f32 2.0, %v736_v21  ;;  %v738_v46 = vpop.f32.mrb[21].mxu0  ;;  %v988_v1 = vsel %vm986_vm5, %v987_v55, %v985_v49  ;;  %vm963_vm6 = vcmp.eq.f32.partialorder %v2385_v37, inf }
 0x300   : > { %v1615_v9 = vpop.eup %1614  ;;  %v830_v10 = vmul.f32 2.0, %v738_v46  ;;  %v740_v35 = vpop.f32.mrb[22].mxu0  ;;  %vm965_vm7 = vcmp.eq.f32.partialorder %v2385_v37, 0.0  ;;  %1626 = vrsqrt.f32 %v2486_v38  ;;  %v1138_v29 = vpack.c.bf16 %v988_v1, %v974_v36 }
 0x301   : > { %v2498_v14 = vpop.eup %1616  ;;  %v861_v16 = vsub.f32 %v2303_v56, %v829_v4  ;;  %v831_v25 = vmul.f32 2.0, %v740_v35  ;;  %v742_v22 = vpop.f32.mrb[23].mxu0  ;;  %v964_v27 = vsel %vm963_vm6, %v2385_v37, %v962_v39  ;;  %v976_v45 = vmul.f32 %v1611_v31, %v2400_v32 }
 0x302   : > { %v1619_v61 = vpop.eup %1618  ;;  %v862_v53 = vsub.f32 %v2309_v58, %v830_v10  ;;  %v832_v57 = vmul.f32 2.0, %v742_v22  ;;  %1153 = vmatprep.subr.bf16.mxu1 %v1138_v29  ;;  %v966_v7 = vand.u32 2147483648, %v2385_v37  ;;  %vm977_vm8 = vcmp.eq.f32.partialorder %v2400_v32, inf }
 0x303   : > { %v2505_v26 = vmax.f32 %v861_v16, 0.0  ;;  %v863_v20 = vsub.f32 %v2312_v59, %v831_v25  ;;  %v978_v58 = vsel %vm977_vm8, %v2400_v32, %v976_v45  ;;  %v980_v40 = vand.u32 2147483648, %v2400_v32 }
 0x304   : > { %v2510_v56 = vmax.f32 %v862_v53, 0.0  ;;  %v864_v28 = vsub.f32 %v2318_v63, %v832_v57  ;;  %v967_v31 = vsel %vm965_vm7, %v966_v7, %v964_v27  ;;  %vm979_vm9 = vcmp.eq.f32.partialorder %v2400_v32, 0.0 }
 0x305   : > { %v2515_v41 = vmax.f32 %v863_v20, 0.0  ;;  %v997_v59 = vmul.f32 %v1615_v9, %v2435_v33  ;;  %1628 = vrsqrt.f32 %v2505_v26  ;;  %v981_v44 = vsel %vm979_vm9, %v980_v40, %v978_v58 }
 0x306   : > { %v2522_v8 = vmax.f32 %v864_v28, 0.0  ;;  %v746_v54 = vpop.f32.mrb[24].mxu0  ;;  %vm998_vm10 = vcmp.eq.f32.partialorder %v2435_v33, inf  ;;  %1630 = vrsqrt.f32 %v2510_v56  ;;  %v1137_v48 = vpack.c.bf16 %v981_v44, %v967_v31 }
 0x307   : > { %v2525_v63 = vpop.eup %1620  ;;  %v833_v60 = vmul.f32 2.0, %v746_v54  ;;  %v748_v37 = vpop.f32.mrb[25].mxu0  ;;  %vm1000_vm11 = vcmp.eq.f32.partialorder %v2435_v33, 0.0  ;;  %1632 = vrsqrt.f32 %v2515_v41  ;;  %v999_v55 = vsel %vm998_vm10, %v2435_v33, %v997_v59 }
 0x308   : > { %v1623_v32 = vpop.eup %1622  ;;  %v834_v49 = vmul.f32 2.0, %v748_v37  ;;  %v750_v21 = vpop.f32.mrb[26].mxu0  ;;  %v1011_v39 = vmul.f32 %v1619_v61, %v2453_v43  ;;  %1634 = vrsqrt.f32 %v2522_v8  ;;  %1154 = vmatpush1.bf16.xpose.msra.mxu1 %v1137_v48  ;;  %vm1012_vm12 = vcmp.eq.f32.partialorder %v2453_v43, inf }
 0x309   : > { %v2532_v4 = vpop.eup %1624  ;;  %v865_v46 = vsub.f32 %v2321_v0, %v833_v60  ;;  %v835_v36 = vmul.f32 2.0, %v750_v21  ;;  %v752_v9 = vpop.f32.mrb[27].mxu0  ;;  %v1001_v1 = vand.u32 2147483648, %v2435_v33  ;;  %v1015_v61 = vand.u32 2147483648, %v2453_v43 }
 0x30a   : > { %v866_v10 = vsub.f32 %v2325_v5, %v834_v49  ;;  %v836_v35 = vmul.f32 2.0, %v752_v9  ;;  %v1013_v16 = vsel %vm1012_vm12, %v2453_v43, %v1011_v39  ;;  %v1627_v25 = vpop.eup %1626  ;;  %v990_v0 = vmul.f32 %v2490_v3, %v2428_v47 }
 0x30b   : > { %v2540_v22 = vmax.f32 %v865_v46, 0.0  ;;  %v867_v29 = vsub.f32 %v2328_v6, %v835_v36  ;;  %v1002_v5 = vsel %vm1000_vm11, %v1001_v1, %v999_v55  ;;  %vm1014_vm13 = vcmp.eq.f32.partialorder %v2453_v43, 0.0 }
 0x30c   : > { %v2546_v53 = vmax.f32 %v866_v10, 0.0  ;;  %v868_v57 = vsub.f32 %v2332_v11, %v836_v35  ;;  %v1016_v45 = vsel %vm1014_vm13, %v1015_v61, %v1013_v16  ;;  %vm991_vm14 = vcmp.eq.f32.partialorder %v2428_v47, inf }
 0x30d   : > { %1636 = vrsqrt.f32 %v2540_v22  ;;  %v2553_v27 = vmax.f32 %v867_v29, 0.0  ;;  %v1140_v6 = vpack.c.bf16 %v1016_v45, %v1002_v5  ;;  %v992_v3 = vsel %vm991_vm14, %v2428_v47, %v990_v0 }
 0x30e   : > { %1638 = vrsqrt.f32 %v2546_v53  ;;  %vm993_vm15 = vcmp.eq.f32.partialorder %v2428_v47, 0.0  ;;  %v756_v11 = vpop.f32.mrb[28].mxu0  ;;  %v2560_v33 = vmax.f32 %v868_v57, 0.0  ;;  %v994_v43 = vand.u32 2147483648, %v2428_v47 }
 0x30f   : > { %1640 = vrsqrt.f32 %v2553_v27  ;;  %v1004_v20 = vmul.f32 %v2498_v14, %v2443_v62  ;;  %v758_v7 = vpop.f32.mrb[29].mxu0  ;;  %v2565_v28 = vpop.eup %1628  ;;  %1155 = vmatprep.subr.bf16.mxu1 %v1140_v6  ;;  %vm1005_vm0 = vcmp.eq.f32.partialorder %v2443_v62, inf  ;;  %vm1007_vm1 = vcmp.eq.f32.partialorder %v2443_v62, 0.0 }
 0x310   : > { %v1008_v58 = vand.u32 2147483648, %v2443_v62  ;;  %v837_v40 = vmul.f32 2.0, %v756_v11  ;;  %v760_v31 = vpop.f32.mrb[30].mxu0  ;;  %v1631_v59 = vpop.eup %1630  ;;  %v838_v54 = vmul.f32 2.0, %v758_v7  ;;  %v1025_v14 = vmul.f32 %v1623_v32, %v2475_v42 }
 0x311   : > { %v1006_v44 = vsel %vm1005_vm0, %v2443_v62, %v1004_v20  ;;  %v839_v48 = vmul.f32 2.0, %v760_v31  ;;  %v762_v60 = vpop.f32.mrb[31].mxu0  ;;  %v2572_v37 = vpop.eup %1632  ;;  %v995_v49 = vsel %vm993_vm15, %v994_v43, %v992_v3  ;;  %vm1026_vm2 = vcmp.eq.f32.partialorder %v2475_v42, inf }
 0x312   : > { %v1009_v21 = vsel %vm1007_vm1, %v1008_v58, %v1006_v44  ;;  %v869_v55 = vsub.f32 %v2335_v12, %v837_v40  ;;  %v840_v39 = vmul.f32 2.0, %v762_v60  ;;  %v1635_v46 = vpop.eup %1634  ;;  %v870_v9 = vsub.f32 %v2339_v17, %v838_v54 }
 0x313   : > { %v1139_v36 = vpack.c.bf16 %v1009_v21, %v995_v49  ;;  %v871_v62 = vsub.f32 %v2342_v24, %v839_v48  ;;  %1642 = vrsqrt.f32 %v2560_v33  ;;  %v1027_v47 = vsel %vm1026_vm2, %v2475_v42, %v1025_v14 }
 0x314   : > { %v2581_v32 = vmax.f32 %v869_v55, 0.0  ;;  %v872_v10 = vsub.f32 %v2347_v30, %v840_v39  ;;  %v2585_v35 = vmax.f32 %v870_v9, 0.0  ;;  %vm1028_vm3 = vcmp.eq.f32.partialorder %v2475_v42, 0.0 }
 0x315   : > { %1156 = vmatpush1.bf16.xpose.msra.mxu1 %v1139_v36  ;;  %v1029_v12 = vand.u32 2147483648, %v2475_v42  ;;  %v1039_v17 = vmul.f32 %v1627_v25, %v2486_v38  ;;  %v2591_v24 = vmax.f32 %v871_v62, 0.0  ;;  %vm1040_vm4 = vcmp.eq.f32.partialorder %v2486_v38, inf }
 0x316   : > { %1644 = vrsqrt.f32 %v2581_v32  ;;  %v2593_v1 = vmax.f32 %v872_v10, 0.0  ;;  %v1043_v61 = vand.u32 2147483648, %v2486_v38  ;;  %v1018_v42 = vmul.f32 %v2525_v63, %v2470_v15 }
 0x317   : > { %v2596_v30 = vpop.eup %1636  ;;  %v1030_v16 = vsel %vm1028_vm3, %v1029_v12, %v1027_v47  ;;  %v1041_v29 = vsel %vm1040_vm4, %v2486_v38, %v1039_v17  ;;  %1646 = vrsqrt.f32 %v2585_v35  ;;  %vm1042_vm5 = vcmp.eq.f32.partialorder %v2486_v38, 0.0 }
 0x318   : > { %v1639_v0 = vpop.eup %1638  ;;  %vm1019_vm6 = vcmp.eq.f32.partialorder %v2470_v15, inf  ;;  %v1022_v25 = vand.u32 2147483648, %v2470_v15  ;;  %v1044_v5 = vsel %vm1042_vm5, %v1043_v61, %v1041_v29  ;;  %vm1021_vm7 = vcmp.eq.f32.partialorder %v2470_v15, 0.0 }
 0x319   : > { %v2606_v57 = vpop.eup %1640  ;;  %v1020_v45 = vsel %vm1019_vm6, %v2470_v15, %v1018_v42  ;;  %v1032_v6 = vmul.f32 %v2532_v4, %v2481_v34  ;;  %1648 = vrsqrt.f32 %v2593_v1  ;;  %v1142_v63 = vpack.c.bf16 %v1044_v5, %v1030_v16 }
 0x31a   : > { %v1023_v3 = vsel %vm1021_vm7, %v1022_v25, %v1020_v45  ;;  %vm1033_vm8 = vcmp.eq.f32.partialorder %v2481_v34, inf  ;;  %vm1035_vm9 = vcmp.eq.f32.partialorder %v2481_v34, 0.0  ;;  %v1036_v11 = vand.u32 2147483648, %v2481_v34 }
 0x31b   : > { %v1034_v38 = vsel %vm1033_vm8, %v2481_v34, %v1032_v6  ;;  %v1053_v43 = vmul.f32 %v1631_v59, %v2510_v56  ;;  %1157 = vmatprep.subr.bf16.mxu1 %v1142_v63  ;;  %vm1054_vm10 = vcmp.eq.f32.partialorder %v2510_v56, inf  ;;  %vm1056_vm11 = vcmp.eq.f32.partialorder %v2510_v56, 0.0 }
 0x31c   : > { %v1057_v15 = vand.u32 2147483648, %v2510_v56  ;;  %v1067_v4 = vmul.f32 %v1635_v46, %v2522_v8  ;;  %v1037_v20 = vsel %vm1035_vm9, %v1036_v11, %v1034_v38  ;;  %vm1068_vm12 = vcmp.eq.f32.partialorder %v2522_v8, inf }
 0x31d   : > { %v1055_v7 = vsel %vm1054_vm10, %v2510_v56, %v1053_v43  ;;  %v1071_v58 = vand.u32 2147483648, %v2522_v8  ;;  %v1643_v40 = vpop.eup %1642  ;;  %v1141_v34 = vpack.c.bf16 %v1037_v20, %v1023_v3  ;;  %vm1070_vm13 = vcmp.eq.f32.partialorder %v2522_v8, 0.0 }
 0x31e   : > { %v1069_v31 = vsel %vm1068_vm12, %v2522_v8, %v1067_v4  ;;  %v1046_v59 = vmul.f32 %v2565_v28, %v2505_v26  ;;  %1650 = vrsqrt.f32 %v2591_v24  ;;  %v1058_v44 = vsel %vm1056_vm11, %v1057_v15, %v1055_v7 }
 0x31f   : > { %v1072_v54 = vsel %vm1070_vm13, %v1071_v58, %v1069_v31  ;;  %vm1047_vm14 = vcmp.eq.f32.partialorder %v2505_v26, inf  ;;  %1158 = vmatpush1.bf16.xpose.msra.mxu1 %v1141_v34  ;;  %v1050_v14 = vand.u32 2147483648, %v2505_v26  ;;  %v1060_v49 = vmul.f32 %v2572_v37, %v2515_v41  ;;  %v1129_v34 = vld [vmem:[#allocation7] sm:$0xff] }
 0x320   : > { %v1645_v56 = vpop.eup %1644  ;;  %v1144_v48 = vpack.c.bf16 %v1072_v54, %v1058_v44  ;;  %v1048_v60 = vsel %vm1047_vm14, %v2505_v26, %v1046_v59  ;;  %vm1049_vm15 = vcmp.eq.f32.partialorder %v2505_v26, 0.0  ;;  %vm1061_vm0 = vcmp.eq.f32.partialorder %v2515_v41, inf  ;;  %v1192_v59 = vpop.permute.xlu0 %1191  ;;  %v562_v44 = vld [vmem:[%s261_s6] sm:$0xff] }
 0x321   : > { %v1064_v8 = vand.u32 2147483648, %v2515_v41  ;;  %v1081_v28 = vmul.f32 %v1639_v0, %v2546_v53  ;;  %v1647_v21 = vpop.eup %1646  ;;  %v1051_v55 = vsel %vm1049_vm15, %v1050_v14, %v1048_v60  ;;  %v1062_v39 = vsel %vm1061_vm0, %v2515_v41, %v1060_v49 }
 0x322   : > { %1159 = vmatprep.subr.bf16.mxu1 %v1144_v48  ;;  %vm1063_vm1 = vcmp.eq.f32.partialorder %v2515_v41, 0.0  ;;  %vm1082_vm2 = vcmp.eq.f32.partialorder %v2546_v53, inf  ;;  %v1085_v26 = vand.u32 2147483648, %v2546_v53  ;;  %v1095_v36 = vmul.f32 %v1643_v40, %v2560_v33 }
 0x323   : > { %v1065_v46 = vsel %vm1063_vm1, %v1064_v8, %v1062_v39  ;;  %v1083_v37 = vsel %vm1082_vm2, %v2546_v53, %v1081_v28  ;;  %v1649_v9 = vpop.eup %1648  ;;  %vm1084_vm3 = vcmp.eq.f32.partialorder %v2546_v53, 0.0  ;;  %vm1096_vm4 = vcmp.eq.f32.partialorder %v2560_v33, inf }
 0x324   : > { %v1143_v62 = vpack.c.bf16 %v1065_v46, %v1051_v55  ;;  %v1099_v10 = vand.u32 2147483648, %v2560_v33  ;;  %v1086_v47 = vsel %vm1084_vm3, %v1085_v26, %v1083_v37  ;;  %v1097_v41 = vsel %vm1096_vm4, %v2560_v33, %v1095_v36  ;;  %v1216_v46 = vld [vmem:[#allocation3] sm:$0xff] }
 0x325   : > { %vm1098_vm5 = vcmp.eq.f32.partialorder %v2560_v33, 0.0  ;;  %v1074_v12 = vmul.f32 %v2596_v30, %v2540_v22  ;;  %vm1075_vm6 = vcmp.eq.f32.partialorder %v2540_v22, inf  ;;  %v1078_v16 = vand.u32 2147483648, %v2540_v22 }
 0x326   : > { %v1100_v17 = vsel %vm1098_vm5, %v1099_v10, %v1097_v41  ;;  %v1088_v53 = vmul.f32 %v2606_v57, %v2553_v27  ;;  %vm1089_vm7 = vcmp.eq.f32.partialorder %v2553_v27, inf  ;;  %v1092_v42 = vand.u32 2147483648, %v2553_v27 }
 0x327   : > { %v1146_v29 = vpack.c.bf16 %v1100_v17, %v1086_v47  ;;  %v1076_v61 = vsel %vm1075_vm6, %v2540_v22, %v1074_v12  ;;  %1160 = vmatpush1.bf16.xpose.msra.mxu1 %v1143_v62  ;;  %vm1077_vm8 = vcmp.eq.f32.partialorder %v2540_v22, 0.0  ;;  %vm1091_vm9 = vcmp.eq.f32.partialorder %v2553_v27, 0.0 }
 0x328   : > { %v1090_v33 = vsel %vm1089_vm7, %v2553_v27, %v1088_v53  ;;  %v1109_v30 = vmul.f32 %v1647_v21, %v2585_v35  ;;  %v1651_v0 = vpop.eup %1650  ;;  %v1079_v25 = vsel %vm1077_vm8, %v1078_v16, %v1076_v61  ;;  %vm1110_vm10 = vcmp.eq.f32.partialorder %v2585_v35, inf  ;;  %v1278_v53 = vld [vmem:[#allocation7] sm:$0xff] (!%p1428_p2) }
 0x329   : > { %1161 = vmatprep.subr.bf16.mxu1 %v1146_v29  ;;  %v1093_v57 = vsel %vm1091_vm9, %v1092_v42, %v1090_v33  ;;  %v1123_v5 = vmul.f32 %v1649_v9, %v2593_v1  ;;  %vm1124_vm11 = vcmp.eq.f32.partialorder %v2593_v1, inf  ;;  %v1113_v22 = vand.u32 2147483648, %v2585_v35  ;;  %v1223_v9 = vld [vmem:[#allocation4] sm:$0xff]  ;;  %v1279_v29 = vld [vmem:[#allocation7 + $0x8] sm:$0xff] (!%p1428_p2) }
 0x32a   : > { %v1145_v45 = vpack.c.bf16 %v1093_v57, %v1079_v25  ;;  %v1111_v6 = vsel %vm1110_vm10, %v2585_v35, %v1109_v30  ;;  %v1127_v27 = vand.u32 2147483648, %v2593_v1  ;;  %v1102_v3 = vmul.f32 %v1645_v56, %v2581_v32 }
 0x32b   : > { %v1125_v63 = vsel %vm1124_vm11, %v2593_v1, %v1123_v5  ;;  %vm1112_vm12 = vcmp.eq.f32.partialorder %v2585_v35, 0.0  ;;  %vm1126_vm13 = vcmp.eq.f32.partialorder %v2593_v1, 0.0  ;;  %vm1103_vm14 = vcmp.eq.f32.partialorder %v2581_v32, inf }
 0x32c   : > { %v1116_v38 = vmul.f32 %v1651_v0, %v2591_v24  ;;  %v1114_v11 = vsel %vm1112_vm12, %v1113_v22, %v1111_v6  ;;  %v1128_v43 = vsel %vm1126_vm13, %v1127_v27, %v1125_v63  ;;  %v1104_v15 = vsel %vm1103_vm14, %v2581_v32, %v1102_v3 }
 0x32d   : > { %vm1117_vm15 = vcmp.eq.f32.partialorder %v2591_v24, inf  ;;  %v1148_v4 = vpack.c.bf16 %v1128_v43, %v1114_v11  ;;  %v1106_v20 = vand.u32 2147483648, %v2581_v32  ;;  %v1120_v35 = vand.u32 2147483648, %v2591_v24 }
 0x32e   : > { %v1118_v7 = vsel %vm1117_vm15, %v2591_v24, %v1116_v38  ;;  %vm1105_vm0 = vcmp.eq.f32.partialorder %v2581_v32, 0.0  ;;  %vm1119_vm1 = vcmp.eq.f32.partialorder %v2591_v24, 0.0  ;;  %v1131_v31 = vpack.c.bf16 %v1129_v34, %v1129_v34 }
 0x32f   : > { %1162 = vmatpush1.bf16.xpose.msra.mxu1 %v1145_v45  ;;  %v1107_v1 = vsel %vm1105_vm0, %v1106_v20, %v1104_v15  ;;  %v1121_v58 = vsel %vm1119_vm1, %v1120_v35, %v1118_v7  ;;  %vm1194_vm2 = vcmp.ge.f32.partialorder %v562_v44, %v1192_v59  ;;  %vm1195_vm3 = vcmp.gt.f32.partialorder %v562_v44, 0.0 }
 0x330   : > { %1163 = vmatprep.subr.bf16.mxu1 %v1148_v4  ;;  %v1147_v40 = vpack.c.bf16 %v1121_v58, %v1107_v1  ;;  %vm2684_vm4 = vmand %vm1194_vm2, %vm1195_vm3  ;;  %v1897_v49 = vmov 0.0   ;;  %vm1221_vm5 = vcmask 7168   ;;  %vm1898_vm6 = vmmov 0  }
 0x331   : > { %v1280_v42 = vadd.f32 (!%p1428_p2), %v1279_v29, %v1278_v53  ;;  %v1899_v33 = vmov (!%p1428_p2), 0  }
 0x337   : > { %1164 = vmatpush1.bf16.xpose.msra.mxu1 %v1147_v40 }
 0x338   : > { %1475 = vmatprep.subr.bf16.mxu1 %v1897_v49 }
 0x33e   : > { %1182 = vmatmul.mubr.bf16.vlgmr.msra.gmra.mrb[0].mxu1 %v1131_v31 }
 0x33f   : > { %1476 = vmatpush3.bf16.msra.mxu1 %v2186_v2  ;;  %v1199_v2 = vld [vmem:[#allocation2] sm:$0xff]  ;;  %1491 = vmatprep.mubr.msk.bf16.mxu1 %vm1898_vm6, %v1897_v49 }
 0x340   : > { %1477 = vmatprep.subr.bf16.mxu1 %v1897_v49 }
 0x343   : > { %1478 = vmatpush3.bf16.msra.mxu1 %v2221_v50 }
 0x344   : > { %1479 = vmatprep.subr.bf16.mxu1 %v1897_v49 }
 0x347   : > { %1480 = vmatpush3.bf16.msra.mxu1 %v2225_v51 }
 0x348   : > { %1481 = vmatprep.subr.bf16.mxu1 %v1897_v49 }
 0x34b   : > { %1482 = vmatpush3.bf16.msra.mxu1 %v2229_v52 }
 0x34c   : > { %1483 = vmatprep.subr.bf16.mxu1 %v1897_v49 }
 0x34f   : > { %1484 = vmatpush3.bf16.msra.mxu1 %v2200_v13 }
 0x350   : > { %1485 = vmatprep.subr.bf16.mxu1 %v1897_v49 }
 0x353   : > { %1486 = vmatpush3.bf16.msra.mxu1 %v2207_v18 }
 0x354   : > { %1487 = vmatprep.subr.bf16.mxu1 %v1897_v49 }
 0x357   : > { %1488 = vmatpush3.bf16.msra.mxu1 %v2209_v19 }
 0x358   : > { %1489 = vmatprep.subr.bf16.mxu1 %v1897_v49 }
 0x35b   : > { %1490 = vmatpush3.bf16.msra.mxu1 %v2214_v23 }
 0x411   : > { %v1183_v54 = vpop.f32.mrb[0].mxu1 }
 0x412   : > { %v1197_v32 = vsub.f32 0.0, %v1183_v54  ;;  %v1185_v24 = vpop.f32.mrb[1].mxu1 }
 0x413   : > { %v1186_v48 = vpop.f32.mrb[2].mxu1 }
 0x414   : > { %v1187_v60 = vpop.f32.mrb[3].mxu1  ;;  %v1198_v14 = vsel %vm2684_vm4, %v1197_v32, -1e+30 }
 0x415   : > { %1200 = vmax.xlane.f32.xlu1 %v1198_v14 }
 0x4a2   : > { %v1201_v50 = vpop.xlane.xlu1 %1200 }
 0x4a3   : > { %v1202_v8 = vmax.f32 %v1199_v2, %v1201_v50 }
 0x4a5   : > { %v1203_v51 = vsub.f32 %v1199_v2, %v1202_v8  ;;  %1273 = vst.msk [vmem:[#allocation2] sm:$0xff] %vm1221_vm5, %v1202_v8  ;;  %1208 = vperm.xlu1 %1587, %v1202_v8  }
 0x4a7   : > { %v1204_v52 = vmul.f32 1.442695, %v1203_v51 }
 0x4a9   : > { %1652 = vpow2.f32 %v1204_v52  ;;  %1657 = vset.pattern.permute.xlu1 (!%p1428_p2), %v1899_v33 }
 0x4b3   : > { %v1653_v13 = vpop.eup %1652 }
 0x4b4   : > { %1226 = vperm.xlu0 %1586, %v1653_v13   ;;  %v1217_v37 = vmul.f32 %v1653_v13, %v1216_v46 }
 0x4b8   : > { %1656 = vset.pattern.permute.xlu0 (!%p1428_p2), %v1899_v33 }
 0x4d3   : > { %1281 = vadd.xlane.f32.xlu0 (!%p1428_p2), %v1280_v42 }
 0x524   : > { %v1209_v18 = vpop.permute.xlu1 %1208 }
 0x525   : > { %v1211_v28 = vsub.f32 %v1198_v14, %v1209_v18 }
 0x527   : > { %v1212_v19 = vmul.f32 1.442695, %v1211_v28 }
 0x529   : > { %1654 = vpow2.f32 %v1212_v19 }
 0x533   : > { %v1655_v21 = vpop.eup %1654  ;;  %v1227_v62 = vpop.permute.xlu0 %1226 }
 0x534   : > { %v1214_v23 = vsel %vm2684_vm4, %v1655_v21, 0.0  ;;  %v1229_v10 = vmul.f32 %v1227_v62, %v1223_v9 }
 0x535   : > { %v1215_v55 = vmul.f32 %v1214_v23, %v562_v44 }
 0x537   : > { %1218 = vadd.xlane.f32.xlu1 %v1215_v55  ;;  %v1230_v39 = vpack.c.bf16 %v1215_v55, %v1215_v55 }
 0x539   : > { %1492 = vmatmul.mubr.bf16.vlgmr.msra.gmra.mrb[4].mxu1 %v1230_v39 }
 0x560   : > { %v1282_v5 = vpop.xlane.xlu0 (!%p1428_p2), %1281 }
 0x5c4   : > { %v1219_v26 = vpop.xlane.xlu1 %1218 }
 0x5c5   : > { %v1220_v36 = vadd.f32 %v1219_v26, %v1217_v37 }
 0x5c7   : > { %1222 = vst.msk [vmem:[#allocation3] sm:$0xff] %vm1221_vm5, %v1220_v36 }
 0x5ce   : > { %v1283_v61 = vld [vmem:[#allocation3] sm:$0xff] (!%p1428_p2) }
 0x5cf   : > { %vm1284_vm7 = vcmp.gt.f32.partialorder (!%p1428_p2), %v1283_v61, 0.0 }
 0x5d0   : > { %v1295_v30 = vsel (!%p1428_p2), %vm1284_vm7, 1, %v1899_v33  ;;  %v1285_v0 = vsel (!%p1428_p2), %vm1284_vm7, %v1283_v61, 1.0 }
 0x5d1   : > { %1297 = vperm.xlu1 (!%p1428_p2), %1657, %v1295_v30   ;;  %1658 = vrcp.f32 (!%p1428_p2), %v1285_v0 }
 0x5db   : > { %v1659_v25 = vpop.eup (!%p1428_p2), %1658 }
 0x5dc   : > { %1291 = vperm.xlu0 (!%p1428_p2), %1656, %v1659_v25  }
 0x609   : > { %1277 = sbr.rel (%p1428_p2) target bundleno = 1632 (0x660), region = 68 }
 0x60c   : > { %v1265_v47 = vpop.f32.mrb[4].mxu1 }
 0x60d   : > { %v1271_v41 = vadd.f32 %v1265_v47, %v1229_v10  ;;  %v1493_v12 = vpop.f32.mrb[5].mxu1 }
 0x60e   : > { %v1268_v17 = vpop.f32.mrb[6].mxu1 }
 0x60f   : > { %1272 = vst [vmem:[#allocation4] sm:$0xff] %v1271_v41  ;;  %v1494_v16 = vpop.f32.mrb[7].mxu1 }
 0x616   : > { %v1286_v57 = vld [vmem:[#allocation4] sm:$0xff] }
 0x617   : > { %v1287_v6 = vmul.f32 %v1286_v57, %v1282_v5 }
 0x650   : > { %v1298_v45 = vpop.permute.xlu1 %1297 }
 0x651   : > { %vm1299_vm8 = vcmp.eq.s32.totalorder %v1298_v45, 1 }
 0x65b   : > { %v1292_v22 = vpop.permute.xlu0 %1291 }
 0x65c   : > { %v1294_v63 = vmul.f32 %v1292_v22, %v1287_v6 }
 0x65e   : > { %v1300_v27 = vsel %vm1299_vm8, %v1294_v63, 0.0 }
 0x65f   : > { %1301 = vst [vmem:[#allocation16] sm:$0xff] %v1300_v27 }
 0x660 PF: > { %p1539_p13 = scmp.eq.s32.totalorder %s1950_s22, 1  ;;  %s1900_s23 = smov [#allocation16]  }
 0x661   : > { %s1309_s13 = sshll.u32 %s1900_s23, 4  ;;  %s1310_s13 = int_to_ptr.vmem [resolvable:$true] %s1309_s13 }
 0x662   : > { %s1804_s16 = scalar_lea.vmem %s1310_s13, 128  ;;  %p1811_p6 = scmp.lt.s32.totalorder %s1310_s13, %s1310_s13 }
 0x663   : > { %p1805_p3 = scmp.ne.s32.totalorder %s1310_s13, %s1804_s16  ;;  %p1812_p7 = scmp.lt.s32.totalorder %s1804_s16, %s1804_s16 }
 0x665   : > { %p1806_p10 = pnand %p1805_p3, %p1539_p13  ;;  %p1813_p11 = por %p1812_p7, %p1811_p6 }
 0x667   : > { %p1807_p9 = pneg %p1806_p10 }
 0x669   : > { %p1814_p8 = pnand %p1813_p11, %p1807_p9 }
 0x66b   : > { %1817 = shalt.err (!%p1814_p8)
}
 0x66c   : > { %s1818_s28 = scalar_lea.hbm %s2744_s5, 128 }
 0x66d   : > { %p1819_p1 = scmp.ne.s32.totalorder %s2744_s5, %s1818_s28  ;;  %p1824_p12 = scmp.lt.u32.totalorder %s1818_s28, %s2744_s5 }
 0x66f   : > { %p1820_p4 = pnand %p1819_p1, %p1539_p13 }
 0x671   : > { %p1821_p5 = pneg %p1820_p4 }
 0x673   : > { %p1826_p0 = pnand %p1824_p12, %p1821_p5 }
 0x675   : > { %1829 = shalt.err (!%p1826_p0)
}
 0x676   : > { %1512 = dma.vmem_to_hbm [thread:$0]  (%p1539_p13), %s1310_s13, 128, %s2744_s5, [#allocation9]  }
 0x677   : > { %1867 = dma.done.wait (%p1539_p13), [#allocation9], 128  }
 0x678   : > { %1869 = vsyncadd (%p1539_p13), [#allocation9], 4294967168 }
 0x679 PF: > { %p18_p2 = scmp.ge.s32.totalorder %s2053_s8, 4   ;;  %s2764_s18 = smov %s1876_s19 }
 0x67a   : > { %s2765_s19 = smov %s1880_s20  ;;  %s2766_s20 = smov %s2063_s10 }
 0x67b   : > { %s2767_s21 = smov %s2053_s8  ;;  %20 = sbr.rel (!%p18_p2) target bundleno = 6 (0x6), region = 109 }
 0x682   :  { %1322 = vsyncpa [#allocation8], 1 }
 0x683   :  { %1324 = vsyncpa [#allocation8 + $0x1], 1 }
 0x684   :  { %1325 = vsyncpa [#allocation11], 1 }
 0x685   :  { %1327 = vsyncpa [#allocation11 + $0x1], 1 }
 0x686   :  { %1328 = vsyncpa [#allocation14], 1 }
 0x687   :  { %1329 = vsyncpa [#allocation9], 1 }
 0x688   :  { %1331 = vsyncpa [#allocation9 + $0x1], 1 }

</bundles_post_ra>
